<compile_context>
chip_gen: v7x
topology: tpu7x:2x2x1
jax: 0.10.0
libtpu: 0.0.40
codegen_flags: <defaults>
</compile_context>

<pallas_src>
import jax
import jax.numpy as jnp
from jax.experimental import pallas as pl
from jax.experimental.pallas import tpu as pltpu

# ---- model config (module defaults, small shapes) -------------------------------
STATE_DIM  = 32
ACTION_DIM = 16
LATENT_DIM = 32                  # latent_dim=None -> state_dim
DEPTH      = 2                   # transformer_depth
HEADS      = 2                   # transformer_heads
DIM_HEAD   = 64                  # transformer_dim_head
INNER      = HEADS * DIM_HEAD    # 128
MLP_DIM    = 128                 # transformer_mlp_dim
EPS        = 1e-5                # nn.LayerNorm default

# ---- packed layouts ---------------------------------------------------------------
SLAB_LANES = 128
TOK_LANES  = 64                  # lanes [0:32] = state, [32:48] = action, [48:64] = zero pad

# global rows (all block starts are multiples of 8)
R_VEC    = 0                                   # 8 rows of per-row vectors
V_POS0, V_POSBA, V_LNFG, V_LNFB, V_BPROJ = 0, 1, 2, 3, 4   # (pos1 + ba folded host-side)
R_WA     = 8                                   # 64 rows: zero-padded action projection (tok -> latent)
R_WPROJ  = R_WA + TOK_LANES                    # 72: output projection (32 -> 32)
R_SEG_F  = R_WPROJ + LATENT_DIM                # 104: head segment-sum matrix (128 -> HEADS)
R_SEG_B  = R_SEG_F + INNER                     # 232: head broadcast matrix (HEADS -> 128), 8 rows
R_LAYER0 = R_SEG_B + 8                         # 240: first transformer layer block

# per-layer sub-offsets
L_VEC  = 0                                     # 8 rows: ln1g, ln1b, bout, ln2g, ln2b, b2, b1, pad
L_WQ   = 8
L_WK   = L_WQ + LATENT_DIM                     # 40
L_WV   = L_WK + LATENT_DIM                     # 72
L_W1   = L_WV + LATENT_DIM                     # 104
L_WOUT = L_W1 + LATENT_DIM                     # 136
L_W2   = L_WOUT + INNER                        # 264
ROWS_PER_LAYER = L_W2 + MLP_DIM                # 392

SLAB_ROWS = R_LAYER0 + DEPTH * ROWS_PER_LAYER  # 1024


# ---- in-kernel math helpers -------------------------------------------------------
def _layernorm(x, g, b):
    mu  = jnp.mean(x, axis=-1, keepdims=True)
    var = jnp.mean((x - mu) ** 2, axis=-1, keepdims=True)
    return (x - mu) * jax.lax.rsqrt(var + EPS) * g + b


def _gelu(x):
    # TODO(synk): torch nn.GELU() default is the exact erf form; erf has no clean
    # Pallas/Mosaic lowering, so the (numerically very close) tanh approximation is used.
    c = jnp.float32(0.7978845608028654)  # sqrt(2/pi)
    return 0.5 * x * (1.0 + jnp.tanh(c * (x + 0.044715 * x * x * x)))


# ---- the Pallas kernel ------------------------------------------------------------
def transition_kernel(tok_ref, slab_ref, out_ref):
    f32 = jnp.float32
    nb = tok_ref.shape[0]                                  # batch-block size (static)
    D = LATENT_DIM

    def vrow(r):                                           # (1, 32) vector row
        return slab_ref[r:r + 1, 0:D]

    # ---- input projections + positional embedding ------------------------------
    tok = tok_ref[...]                                     # (nb, 64)
    s_tok = tok[:, 0:D] + vrow(R_VEC + V_POS0)             # state_proj is Identity (32 == 32)
    wa_pad = slab_ref[R_WA:R_WA + TOK_LANES, 0:D]          # (64, 32), only action rows nonzero
    a_tok = jnp.dot(tok, wa_pad, preferred_element_type=f32) + vrow(R_VEC + V_POSBA)
    # token-major residual stream: rows [0:nb] = token 0 (state), rows [nb:2nb] = token 1 (action)
    x = jnp.concatenate([s_tok, a_tok], axis=0)            # (2nb, 32)

    seg_f = slab_ref[R_SEG_F:R_SEG_F + INNER, 0:HEADS]     # (128, 2): per-head segment sum
    seg_b = slab_ref[R_SEG_B:R_SEG_B + HEADS, 0:INNER]     # (2, 128): per-head lane broadcast
    scale = f32(DIM_HEAD) ** -0.5

    for l in range(DEPTH):                                 # DEPTH = 2, fully unrolled
        base = R_LAYER0 + l * ROWS_PER_LAYER
        ln1g, ln1b = vrow(base + L_VEC + 0), vrow(base + L_VEC + 1)
        bout       = vrow(base + L_VEC + 2)
        ln2g, ln2b = vrow(base + L_VEC + 3), vrow(base + L_VEC + 4)
        b2         = vrow(base + L_VEC + 5)
        b1         = slab_ref[base + L_VEC + 6:base + L_VEC + 7, 0:MLP_DIM]      # (1, 128)
        wq   = slab_ref[base + L_WQ:base + L_WQ + D, 0:INNER]                    # (32, 128)
        wk   = slab_ref[base + L_WK:base + L_WK + D, 0:INNER]
        wv   = slab_ref[base + L_WV:base + L_WV + D, 0:INNER]
        w1   = slab_ref[base + L_W1:base + L_W1 + D, 0:MLP_DIM]                  # (32, 128)
        wout = slab_ref[base + L_WOUT:base + L_WOUT + INNER, 0:D]                # (128, 32)
        w2   = slab_ref[base + L_W2:base + L_W2 + MLP_DIM, 0:D]                  # (128, 32)

        # ---------------- attention block (pre-norm), N = 2 tokens ----------------
        xn = _layernorm(x, ln1g, ln1b)
        q = jnp.dot(xn, wq, preferred_element_type=f32)    # (2nb, 128)
        k = jnp.dot(xn, wk, preferred_element_type=f32)
        v = jnp.dot(xn, wv, preferred_element_type=f32)
        # key/value of the *other* token of the same sample: rotate the token halves (XLU)
        k_sw = pltpu.roll(k, shift=nb, axis=0)
        v_sw = pltpu.roll(v, shift=nb, axis=0)
        # per-head score sums via one MXU matmul each (no XLU cross-lane reduces)
        s_s = jnp.dot(q * k,    seg_f, preferred_element_type=f32) * scale       # (2nb, HEADS)
        s_o = jnp.dot(q * k_sw, seg_f, preferred_element_type=f32) * scale
        # softmax over two scalars per (row, head): VPU max + EUP approximate reciprocal
        m   = jnp.maximum(s_s, s_o)
        e_s = jnp.exp(s_s - m)
        e_o = jnp.exp(s_o - m)
        inv = pl.reciprocal(e_s + e_o, approx=True)
        # broadcast head weights back to 64-lane head blocks and mix on full 128-lane vregs
        p_s = jnp.dot(e_s * inv, seg_b, preferred_element_type=f32)              # (2nb, 128)
        p_o = jnp.dot(e_o * inv, seg_b, preferred_element_type=f32)
        mixed = p_s * v + p_o * v_sw                                             # (2nb, 128)
        x = x + jnp.dot(mixed, wout, preferred_element_type=f32) + bout          # single W_out matmul

        # ---------------- feed-forward block (pre-norm) ----------------
        xn = _layernorm(x, ln2g, ln2b)
        h1 = _gelu(jnp.dot(xn, w1, preferred_element_type=f32) + b1)             # (2nb, 128)
        x = x + jnp.dot(h1, w2, preferred_element_type=f32) + b2

    # final LayerNorm of the transformer, take token-0 rows, output projection
    x = _layernorm(x, vrow(R_VEC + V_LNFG), vrow(R_VEC + V_LNFB))
    x0 = x[0:nb, :]
    wproj = slab_ref[R_WPROJ:R_WPROJ + D, 0:D]
    out_ref[...] = jnp.dot(x0, wproj, preferred_element_type=f32) + vrow(R_VEC + V_BPROJ)


# ---- host-side parameter packing (done once; reused across calls) -----------------
def pack_params(p):
    def pad_lanes(m):                                  # (r, n) -> (r, 128)
        return jnp.pad(m.astype(jnp.float32), ((0, 0), (0, SLAB_LANES - m.shape[-1])))

    def zero_rows(n):
        return jnp.zeros((n, SLAB_LANES), jnp.float32)

    blocks = []
    # R_VEC: pos0 | (pos1 + ba) | lnf_g | lnf_b | bproj | 3 pad rows
    blocks.append(jnp.concatenate([
        pad_lanes(p['pos'][0:1]),
        pad_lanes(p['pos'][1:2] + p['ba']),
        pad_lanes(p['lnfg']), pad_lanes(p['lnfb']), pad_lanes(p['bproj']),
        zero_rows(3)], axis=0))
    # R_WA: zero-padded action projection acting on the packed token vector
    wa_pad = jnp.zeros((TOK_LANES, SLAB_LANES), jnp.float32)
    wa_pad = wa_pad.at[STATE_DIM:STATE_DIM + ACTION_DIM, 0:LATENT_DIM].set(p['wa'])
    blocks.append(wa_pad)
    # R_WPROJ
    blocks.append(pad_lanes(p['wproj']))
    # R_SEG_F: seg_f[j, h] = 1 if lane j belongs to head h
    seg_f = jnp.zeros((INNER, SLAB_LANES), jnp.float32)
    for h in range(HEADS):
        seg_f = seg_f.at[h * DIM_HEAD:(h + 1) * DIM_HEAD, h].set(1.0)
    blocks.append(seg_f)
    # R_SEG_B: seg_b[h, j] = 1 if lane j belongs to head h (8 rows, only first HEADS used)
    seg_b = jnp.zeros((8, SLAB_LANES), jnp.float32)
    for h in range(HEADS):
        seg_b = seg_b.at[h, h * DIM_HEAD:(h + 1) * DIM_HEAD].set(1.0)
    blocks.append(seg_b)
    # per-layer blocks
    for l in range(DEPTH):
        blocks.append(jnp.concatenate([
            pad_lanes(p['ln1g'][l]), pad_lanes(p['ln1b'][l]), pad_lanes(p['bout'][l]),
            pad_lanes(p['ln2g'][l]), pad_lanes(p['ln2b'][l]), pad_lanes(p['b2'][l]),
            pad_lanes(p['b1'][l]), zero_rows(1)], axis=0))
        wqkv = p['wqkv'][l]
        blocks.append(pad_lanes(wqkv[:, 0:INNER]))               # wq
        blocks.append(pad_lanes(wqkv[:, INNER:2 * INNER]))       # wk
        blocks.append(pad_lanes(wqkv[:, 2 * INNER:3 * INNER]))   # wv
        blocks.append(pad_lanes(p['w1'][l]))
        blocks.append(pad_lanes(p['wout'][l]))
        blocks.append(pad_lanes(p['w2'][l]))

    slab = jnp.concatenate(blocks, axis=0)
    assert slab.shape == (SLAB_ROWS, SLAB_LANES), slab.shape
    return slab


# ---- wrapper ---------------------------------------------------------------------
@jax.jit
def transition_forward(state, action, slab):
    if state.shape[-1] != STATE_DIM:
        raise ValueError(f'Expected state embedding dimension {STATE_DIM}, got {state.shape[-1]}')
    if action.shape[-1] != ACTION_DIM:
        raise ValueError(f'Expected action embedding dimension {ACTION_DIM}, got {action.shape[-1]}')
    if state.shape[0] != action.shape[0]:
        raise ValueError(f'Batch size mismatch: state {state.shape[0]}, action {action.shape[0]}')
    bsz = state.shape[0]
    # batch-block of 8 rows (8-aligned sublanes) when possible; otherwise one block = whole batch
    bb = 8 if bsz % 8 == 0 else bsz
    pad = TOK_LANES - STATE_DIM - ACTION_DIM
    tok = jnp.concatenate([state.astype(jnp.float32), action.astype(jnp.float32),
                           jnp.zeros((bsz, pad), jnp.float32)], axis=-1)     # (B, 64)
    return pl.pallas_call(
        transition_kernel,
        out_shape=jax.ShapeDtypeStruct((bsz, LATENT_DIM), jnp.float32),
        grid=(bsz // bb,),
        in_specs=[pl.BlockSpec((bb, TOK_LANES), lambda i: (i, 0)),
                  pl.BlockSpec((SLAB_ROWS, SLAB_LANES), lambda i: (0, 0))],  # params resident
        out_specs=pl.BlockSpec((bb, LATENT_DIM), lambda i: (i, 0)),
        compiler_params=pltpu.CompilerParams(dimension_semantics=("parallel",)),
    )(tok, slab)


# ---- deterministic parameter construction ----------------------------------------
def make_params(key):
    ks = jax.random.split(key, 16)
    n = lambda k, shape, std=0.02: (std * jax.random.normal(k, shape)).astype(jnp.float32)
    zeros = lambda shape: jnp.zeros(shape, jnp.float32)
    ones = lambda shape: jnp.ones(shape, jnp.float32)
    return {
        'pos':   n(ks[0], (2, LATENT_DIM)),                       # nn.init.normal_(std=0.02)
        'wa':    n(ks[1], (ACTION_DIM, LATENT_DIM)),
        'ba':    zeros((1, LATENT_DIM)),
        'ln1g':  ones((DEPTH, 1, LATENT_DIM)),
        'ln1b':  zeros((DEPTH, 1, LATENT_DIM)),
        'wqkv':  n(ks[2], (DEPTH, LATENT_DIM, 3 * INNER)),        # to_qkv has bias=False
        'wout':  n(ks[3], (DEPTH, INNER, LATENT_DIM)),
        'bout':  zeros((DEPTH, 1, LATENT_DIM)),
        'ln2g':  ones((DEPTH, 1, LATENT_DIM)),
        'ln2b':  zeros((DEPTH, 1, LATENT_DIM)),
        'w1':    n(ks[4], (DEPTH, LATENT_DIM, MLP_DIM)),
        'b1':    zeros((DEPTH, 1, MLP_DIM)),
        'w2':    n(ks[5], (DEPTH, MLP_DIM, LATENT_DIM)),
        'b2':    zeros((DEPTH, 1, LATENT_DIM)),
        'lnfg':  ones((1, LATENT_DIM)),
        'lnfb':  zeros((1, LATENT_DIM)),
        'wproj': n(ks[6], (LATENT_DIM, LATENT_DIM)),
        'bproj': zeros((1, LATENT_DIM)),
    }


# ---- pure-JAX reference (exact softmax / divide) for a sanity check ---------------
def reference_forward(state, action, p):
    s = state
    act = action @ p['wa'] + p['ba']
    x = jnp.concatenate([s[:, None, :], act[:, None, :]], axis=1) + p['pos']
    scale = DIM_HEAD ** -0.5
    for l in range(DEPTH):
        xn = _layernorm(x, p['ln1g'][l], p['ln1b'][l])
        qkv = jnp.einsum('bnd,de->bne', xn, p['wqkv'][l])
        q, k, v = qkv[..., :INNER], qkv[..., INNER:2 * INNER], qkv[..., 2 * INNER:]
        heads = []
        for h in range(HEADS):
            sl = slice(h * DIM_HEAD, (h + 1) * DIM_HEAD)
            d = jnp.einsum('bnd,bmd->bnm', q[..., sl], k[..., sl]) * scale
            attn = jax.nn.softmax(d, axis=-1)
            heads.append(jnp.einsum('bnm,bmd->bnd', attn, v[..., sl]))
        o = jnp.concatenate(heads, axis=-1)
        x = x + jnp.einsum('bne,ed->bnd', o, p['wout'][l]) + p['bout'][l]
        xn = _layernorm(x, p['ln2g'][l], p['ln2b'][l])
        h1 = _gelu(jnp.einsum('bnd,dm->bnm', xn, p['w1'][l]) + p['b1'][l])
        x = x + jnp.einsum('bnm,md->bnd', h1, p['w2'][l]) + p['b2'][l]
    x = _layernorm(x, p['lnfg'], p['lnfb'])
    return x[:, 0, :] @ p['wproj'] + p['bproj']


if __name__ == "__main__":
    key = jax.random.PRNGKey(0)
    k_state, k_action, k_params = jax.random.split(key, 3)

    B = 16   # many (state, action) pairs per call -> amortizes launch; grid=(2,) of 8-row blocks
    encoded_state  = jax.random.normal(k_state,  (B, STATE_DIM),  dtype=jnp.float32)
    encoded_action = jax.random.normal(k_action, (B, ACTION_DIM), dtype=jnp.float32)
    params = make_params(k_params)
    slab = pack_params(params)        # packed once; subsequent calls reuse the single slab

    out = transition_forward(encoded_state, encoded_action, slab)
    out = jax.block_until_ready(out)
    assert out.shape == (B, LATENT_DIM)

    ref = reference_forward(encoded_state, encoded_action, params)
    # tolerance covers the EUP approximate reciprocal in the in-kernel softmax
    assert jnp.allclose(out, ref, atol=2e-3, rtol=2e-3), "kernel/reference mismatch"

    print("KERNEL_OK")
</pallas_src>

<mosaic_0001>
module attributes {stable_mosaic.version = 11 : i64} {
  func.func @transition_kernel(%arg0: i32, %arg1: memref<8x64xf32, #tpu.memory_space<vmem>>, %arg2: memref<1024x128xf32, #tpu.memory_space<vmem>>, %arg3: memref<8x32xf32, #tpu.memory_space<vmem>>) attributes {dimension_semantics = [#tpu.dimension_semantics<parallel>], iteration_bounds = array<i64: 2>, scalar_prefetch = 0 : i64, scratch_operands = 0 : i64, tpu.core_type = #tpu.core_type<tc>, window_params = [{transform_indices = @transform_0, window_bounds = array<i64: 8, 64>}, {pipeline_mode = #tpu.pipeline_mode<synchronous>, transform_indices = @transform_1, window_bounds = array<i64: 1024, 128>}, {transform_indices = @transform_2, window_bounds = array<i64: 8, 32>}]} {
    %c0 = arith.constant 0 : index
    %c0_0 = arith.constant 0 : index
    %0 = vector.load %arg1[%c0, %c0_0] : memref<8x64xf32, #tpu.memory_space<vmem>>, vector<8x64xf32>
    %1 = vector.extract_strided_slice %0 {offsets = [0, 0], sizes = [8, 32], strides = [1, 1]} : vector<8x64xf32> to vector<8x32xf32>
    %c0_1 = arith.constant 0 : index
    %c0_2 = arith.constant 0 : index
    %2 = vector.load %arg2[%c0_1, %c0_2] : memref<1024x128xf32, #tpu.memory_space<vmem>>, vector<1x32xf32>
    %3 = vector.broadcast %2 : vector<1x32xf32> to vector<8x32xf32>
    %4 = arith.addf %1, %3 : vector<8x32xf32>
    %c8 = arith.constant 8 : index
    %c0_3 = arith.constant 0 : index
    %5 = vector.load %arg2[%c8, %c0_3] : memref<1024x128xf32, #tpu.memory_space<vmem>>, vector<64x32xf32>
    %cst = arith.constant dense<0.000000e+00> : vector<8x32xf32>
    %6 = tpu.matmul %0, %5, %cst {dimension_numbers = #tpu.dot_dimension_numbers<[1], [0], [0], [1], [0, 0, 1, 1], [], []>} : vector<8x64xf32>, vector<64x32xf32>, vector<8x32xf32> -> vector<8x32xf32>
    %c1 = arith.constant 1 : index
    %c0_4 = arith.constant 0 : index
    %7 = vector.load %arg2[%c1, %c0_4] : memref<1024x128xf32, #tpu.memory_space<vmem>>, vector<1x32xf32>
    %8 = vector.broadcast %7 : vector<1x32xf32> to vector<8x32xf32>
    %9 = arith.addf %6, %8 : vector<8x32xf32>
    %10 = tpu.concatenate %4, %9 in 0 : vector<8x32xf32>, vector<8x32xf32> -> vector<16x32xf32>
    %c104 = arith.constant 104 : index
    %c0_5 = arith.constant 0 : index
    %11 = vector.load %arg2[%c104, %c0_5] : memref<1024x128xf32, #tpu.memory_space<vmem>>, vector<128x2xf32>
    %c232 = arith.constant 232 : index
    %c0_6 = arith.constant 0 : index
    %12 = vector.load %arg2[%c232, %c0_6] : memref<1024x128xf32, #tpu.memory_space<vmem>>, vector<2x128xf32>
    %cst_7 = arith.constant 6.400000e+01 : f32
    %cst_8 = arith.constant -5.000000e-01 : f32
    %13 = math.powf %cst_7, %cst_8 : f32
    %c240 = arith.constant 240 : index
    %c0_9 = arith.constant 0 : index
    %14 = vector.load %arg2[%c240, %c0_9] : memref<1024x128xf32, #tpu.memory_space<vmem>>, vector<1x32xf32>
    %c241 = arith.constant 241 : index
    %c0_10 = arith.constant 0 : index
    %15 = vector.load %arg2[%c241, %c0_10] : memref<1024x128xf32, #tpu.memory_space<vmem>>, vector<1x32xf32>
    %c242 = arith.constant 242 : index
    %c0_11 = arith.constant 0 : index
    %16 = vector.load %arg2[%c242, %c0_11] : memref<1024x128xf32, #tpu.memory_space<vmem>>, vector<1x32xf32>
    %c243 = arith.constant 243 : index
    %c0_12 = arith.constant 0 : index
    %17 = vector.load %arg2[%c243, %c0_12] : memref<1024x128xf32, #tpu.memory_space<vmem>>, vector<1x32xf32>
    %c244 = arith.constant 244 : index
    %c0_13 = arith.constant 0 : index
    %18 = vector.load %arg2[%c244, %c0_13] : memref<1024x128xf32, #tpu.memory_space<vmem>>, vector<1x32xf32>
    %c245 = arith.constant 245 : index
    %c0_14 = arith.constant 0 : index
    %19 = vector.load %arg2[%c245, %c0_14] : memref<1024x128xf32, #tpu.memory_space<vmem>>, vector<1x32xf32>
    %c246 = arith.constant 246 : index
    %c0_15 = arith.constant 0 : index
    %20 = vector.load %arg2[%c246, %c0_15] : memref<1024x128xf32, #tpu.memory_space<vmem>>, vector<1x128xf32>
    %c248 = arith.constant 248 : index
    %c0_16 = arith.constant 0 : index
    %21 = vector.load %arg2[%c248, %c0_16] : memref<1024x128xf32, #tpu.memory_space<vmem>>, vector<32x128xf32>
    %c280 = arith.constant 280 : index
    %c0_17 = arith.constant 0 : index
    %22 = vector.load %arg2[%c280, %c0_17] : memref<1024x128xf32, #tpu.memory_space<vmem>>, vector<32x128xf32>
    %c312 = arith.constant 312 : index
    %c0_18 = arith.constant 0 : index
    %23 = vector.load %arg2[%c312, %c0_18] : memref<1024x128xf32, #tpu.memory_space<vmem>>, vector<32x128xf32>
    %c344 = arith.constant 344 : index
    %c0_19 = arith.constant 0 : index
    %24 = vector.load %arg2[%c344, %c0_19] : memref<1024x128xf32, #tpu.memory_space<vmem>>, vector<32x128xf32>
    %c376 = arith.constant 376 : index
    %c0_20 = arith.constant 0 : index
    %25 = vector.load %arg2[%c376, %c0_20] : memref<1024x128xf32, #tpu.memory_space<vmem>>, vector<128x32xf32>
    %c504 = arith.constant 504 : index
    %c0_21 = arith.constant 0 : index
    %26 = vector.load %arg2[%c504, %c0_21] : memref<1024x128xf32, #tpu.memory_space<vmem>>, vector<128x32xf32>
    %cst_22 = arith.constant dense<0.000000e+00> : vector<16xf32>
    %27 = vector.multi_reduction <add>, %10, %cst_22 [1] : vector<16x32xf32> to vector<16xf32>
    %28 = vector.shape_cast %27 : vector<16xf32> to vector<16x1xf32>
    %cst_23 = arith.constant 3.200000e+01 : f32
    %29 = vector.broadcast %cst_23 : f32 to vector<16x1xf32>
    %30 = arith.divf %28, %29 : vector<16x1xf32>
    %31 = vector.broadcast %30 : vector<16x1xf32> to vector<16x32xf32>
    %32 = arith.subf %10, %31 : vector<16x32xf32>
    %33 = arith.mulf %32, %32 : vector<16x32xf32>
    %cst_24 = arith.constant dense<0.000000e+00> : vector<16xf32>
    %34 = vector.multi_reduction <add>, %33, %cst_24 [1] : vector<16x32xf32> to vector<16xf32>
    %35 = vector.shape_cast %34 : vector<16xf32> to vector<16x1xf32>
    %cst_25 = arith.constant 3.200000e+01 : f32
    %36 = vector.broadcast %cst_25 : f32 to vector<16x1xf32>
    %37 = arith.divf %35, %36 : vector<16x1xf32>
    %38 = vector.broadcast %30 : vector<16x1xf32> to vector<16x32xf32>
    %39 = arith.subf %10, %38 : vector<16x32xf32>
    %cst_26 = arith.constant 9.99999974E-6 : f32
    %40 = vector.broadcast %cst_26 : f32 to vector<16x1xf32>
    %41 = arith.addf %37, %40 : vector<16x1xf32>
    %42 = math.rsqrt %41 : vector<16x1xf32>
    %43 = vector.broadcast %42 : vector<16x1xf32> to vector<16x32xf32>
    %44 = arith.mulf %39, %43 : vector<16x32xf32>
    %45 = vector.broadcast %14 : vector<1x32xf32> to vector<16x32xf32>
    %46 = arith.mulf %44, %45 : vector<16x32xf32>
    %47 = vector.broadcast %15 : vector<1x32xf32> to vector<16x32xf32>
    %48 = arith.addf %46, %47 : vector<16x32xf32>
    %cst_27 = arith.constant dense<0.000000e+00> : vector<16x128xf32>
    %49 = tpu.matmul %48, %21, %cst_27 {dimension_numbers = #tpu.dot_dimension_numbers<[1], [0], [0], [1], [0, 0, 1, 1], [], []>} : vector<16x32xf32>, vector<32x128xf32>, vector<16x128xf32> -> vector<16x128xf32>
    %cst_28 = arith.constant dense<0.000000e+00> : vector<16x128xf32>
    %50 = tpu.matmul %48, %22, %cst_28 {dimension_numbers = #tpu.dot_dimension_numbers<[1], [0], [0], [1], [0, 0, 1, 1], [], []>} : vector<16x32xf32>, vector<32x128xf32>, vector<16x128xf32> -> vector<16x128xf32>
    %cst_29 = arith.constant dense<0.000000e+00> : vector<16x128xf32>
    %51 = tpu.matmul %48, %23, %cst_29 {dimension_numbers = #tpu.dot_dimension_numbers<[1], [0], [0], [1], [0, 0, 1, 1], [], []>} : vector<16x32xf32>, vector<32x128xf32>, vector<16x128xf32> -> vector<16x128xf32>
    %c8_i32 = arith.constant 8 : i32
    %52 = tpu.dynamic_rotate %50 by %c8_i32 dim 0 : vector<16x128xf32>, i32 -> vector<16x128xf32>
    %c8_i32_30 = arith.constant 8 : i32
    %53 = tpu.dynamic_rotate %51 by %c8_i32_30 dim 0 : vector<16x128xf32>, i32 -> vector<16x128xf32>
    %54 = arith.mulf %49, %50 : vector<16x128xf32>
    %cst_31 = arith.constant dense<0.000000e+00> : vector<16x2xf32>
    %55 = tpu.matmul %54, %11, %cst_31 {dimension_numbers = #tpu.dot_dimension_numbers<[1], [0], [0], [1], [0, 0, 1, 1], [], []>} : vector<16x128xf32>, vector<128x2xf32>, vector<16x2xf32> -> vector<16x2xf32>
    %56 = vector.broadcast %13 : f32 to vector<16x2xf32>
    %57 = arith.mulf %55, %56 : vector<16x2xf32>
    %58 = arith.mulf %49, %52 : vector<16x128xf32>
    %cst_32 = arith.constant dense<0.000000e+00> : vector<16x2xf32>
    %59 = tpu.matmul %58, %11, %cst_32 {dimension_numbers = #tpu.dot_dimension_numbers<[1], [0], [0], [1], [0, 0, 1, 1], [], []>} : vector<16x128xf32>, vector<128x2xf32>, vector<16x2xf32> -> vector<16x2xf32>
    %60 = vector.broadcast %13 : f32 to vector<16x2xf32>
    %61 = arith.mulf %59, %60 : vector<16x2xf32>
    %62 = arith.maximumf %57, %61 : vector<16x2xf32>
    %63 = arith.subf %57, %62 : vector<16x2xf32>
    %64 = math.exp %63 : vector<16x2xf32>
    %65 = arith.subf %61, %62 : vector<16x2xf32>
    %66 = math.exp %65 : vector<16x2xf32>
    %67 = arith.addf %64, %66 : vector<16x2xf32>
    %68 = tpu.reciprocal %67 {approx = true} : vector<16x2xf32> -> vector<16x2xf32>
    %69 = arith.mulf %64, %68 : vector<16x2xf32>
    %cst_33 = arith.constant dense<0.000000e+00> : vector<16x128xf32>
    %70 = tpu.matmul %69, %12, %cst_33 {dimension_numbers = #tpu.dot_dimension_numbers<[1], [0], [0], [1], [0, 0, 1, 1], [], []>} : vector<16x2xf32>, vector<2x128xf32>, vector<16x128xf32> -> vector<16x128xf32>
    %71 = arith.mulf %66, %68 : vector<16x2xf32>
    %cst_34 = arith.constant dense<0.000000e+00> : vector<16x128xf32>
    %72 = tpu.matmul %71, %12, %cst_34 {dimension_numbers = #tpu.dot_dimension_numbers<[1], [0], [0], [1], [0, 0, 1, 1], [], []>} : vector<16x2xf32>, vector<2x128xf32>, vector<16x128xf32> -> vector<16x128xf32>
    %73 = arith.mulf %70, %51 : vector<16x128xf32>
    %74 = arith.mulf %72, %53 : vector<16x128xf32>
    %75 = arith.addf %73, %74 : vector<16x128xf32>
    %cst_35 = arith.constant dense<0.000000e+00> : vector<16x32xf32>
    %76 = tpu.matmul %75, %25, %cst_35 {dimension_numbers = #tpu.dot_dimension_numbers<[1], [0], [0], [1], [0, 0, 1, 1], [], []>} : vector<16x128xf32>, vector<128x32xf32>, vector<16x32xf32> -> vector<16x32xf32>
    %77 = arith.addf %10, %76 : vector<16x32xf32>
    %78 = vector.broadcast %16 : vector<1x32xf32> to vector<16x32xf32>
    %79 = arith.addf %77, %78 : vector<16x32xf32>
    %cst_36 = arith.constant dense<0.000000e+00> : vector<16xf32>
    %80 = vector.multi_reduction <add>, %79, %cst_36 [1] : vector<16x32xf32> to vector<16xf32>
    %81 = vector.shape_cast %80 : vector<16xf32> to vector<16x1xf32>
    %cst_37 = arith.constant 3.200000e+01 : f32
    %82 = vector.broadcast %cst_37 : f32 to vector<16x1xf32>
    %83 = arith.divf %81, %82 : vector<16x1xf32>
    %84 = vector.broadcast %83 : vector<16x1xf32> to vector<16x32xf32>
    %85 = arith.subf %79, %84 : vector<16x32xf32>
    %86 = arith.mulf %85, %85 : vector<16x32xf32>
    %cst_38 = arith.constant dense<0.000000e+00> : vector<16xf32>
    %87 = vector.multi_reduction <add>, %86, %cst_38 [1] : vector<16x32xf32> to vector<16xf32>
    %88 = vector.shape_cast %87 : vector<16xf32> to vector<16x1xf32>
    %cst_39 = arith.constant 3.200000e+01 : f32
    %89 = vector.broadcast %cst_39 : f32 to vector<16x1xf32>
    %90 = arith.divf %88, %89 : vector<16x1xf32>
    %91 = vector.broadcast %83 : vector<16x1xf32> to vector<16x32xf32>
    %92 = arith.subf %79, %91 : vector<16x32xf32>
    %cst_40 = arith.constant 9.99999974E-6 : f32
    %93 = vector.broadcast %cst_40 : f32 to vector<16x1xf32>
    %94 = arith.addf %90, %93 : vector<16x1xf32>
    %95 = math.rsqrt %94 : vector<16x1xf32>
    %96 = vector.broadcast %95 : vector<16x1xf32> to vector<16x32xf32>
    %97 = arith.mulf %92, %96 : vector<16x32xf32>
    %98 = vector.broadcast %17 : vector<1x32xf32> to vector<16x32xf32>
    %99 = arith.mulf %97, %98 : vector<16x32xf32>
    %100 = vector.broadcast %18 : vector<1x32xf32> to vector<16x32xf32>
    %101 = arith.addf %99, %100 : vector<16x32xf32>
    %cst_41 = arith.constant dense<0.000000e+00> : vector<16x128xf32>
    %102 = tpu.matmul %101, %24, %cst_41 {dimension_numbers = #tpu.dot_dimension_numbers<[1], [0], [0], [1], [0, 0, 1, 1], [], []>} : vector<16x32xf32>, vector<32x128xf32>, vector<16x128xf32> -> vector<16x128xf32>
    %103 = vector.broadcast %20 : vector<1x128xf32> to vector<16x128xf32>
    %104 = arith.addf %102, %103 : vector<16x128xf32>
    %cst_42 = arith.constant 5.000000e-01 : f32
    %105 = vector.broadcast %cst_42 : f32 to vector<16x128xf32>
    %106 = arith.mulf %105, %104 : vector<16x128xf32>
    %cst_43 = arith.constant 4.471500e-02 : f32
    %107 = vector.broadcast %cst_43 : f32 to vector<16x128xf32>
    %108 = arith.mulf %107, %104 : vector<16x128xf32>
    %109 = arith.mulf %108, %104 : vector<16x128xf32>
    %110 = arith.mulf %109, %104 : vector<16x128xf32>
    %111 = arith.addf %104, %110 : vector<16x128xf32>
    %cst_44 = arith.constant 0.797884583 : f32
    %112 = vector.broadcast %cst_44 : f32 to vector<16x128xf32>
    %113 = arith.mulf %112, %111 : vector<16x128xf32>
    %114 = math.tanh %113 : vector<16x128xf32>
    %cst_45 = arith.constant 1.000000e+00 : f32
    %115 = vector.broadcast %cst_45 : f32 to vector<16x128xf32>
    %116 = arith.addf %115, %114 : vector<16x128xf32>
    %117 = arith.mulf %106, %116 : vector<16x128xf32>
    %cst_46 = arith.constant dense<0.000000e+00> : vector<16x32xf32>
    %118 = tpu.matmul %117, %26, %cst_46 {dimension_numbers = #tpu.dot_dimension_numbers<[1], [0], [0], [1], [0, 0, 1, 1], [], []>} : vector<16x128xf32>, vector<128x32xf32>, vector<16x32xf32> -> vector<16x32xf32>
    %119 = arith.addf %79, %118 : vector<16x32xf32>
    %120 = vector.broadcast %19 : vector<1x32xf32> to vector<16x32xf32>
    %121 = arith.addf %119, %120 : vector<16x32xf32>
    %c632 = arith.constant 632 : index
    %c0_47 = arith.constant 0 : index
    %122 = vector.load %arg2[%c632, %c0_47] : memref<1024x128xf32, #tpu.memory_space<vmem>>, vector<1x32xf32>
    %c633 = arith.constant 633 : index
    %c0_48 = arith.constant 0 : index
    %123 = vector.load %arg2[%c633, %c0_48] : memref<1024x128xf32, #tpu.memory_space<vmem>>, vector<1x32xf32>
    %c634 = arith.constant 634 : index
    %c0_49 = arith.constant 0 : index
    %124 = vector.load %arg2[%c634, %c0_49] : memref<1024x128xf32, #tpu.memory_space<vmem>>, vector<1x32xf32>
    %c635 = arith.constant 635 : index
    %c0_50 = arith.constant 0 : index
    %125 = vector.load %arg2[%c635, %c0_50] : memref<1024x128xf32, #tpu.memory_space<vmem>>, vector<1x32xf32>
    %c636 = arith.constant 636 : index
    %c0_51 = arith.constant 0 : index
    %126 = vector.load %arg2[%c636, %c0_51] : memref<1024x128xf32, #tpu.memory_space<vmem>>, vector<1x32xf32>
    %c637 = arith.constant 637 : index
    %c0_52 = arith.constant 0 : index
    %127 = vector.load %arg2[%c637, %c0_52] : memref<1024x128xf32, #tpu.memory_space<vmem>>, vector<1x32xf32>
    %c638 = arith.constant 638 : index
    %c0_53 = arith.constant 0 : index
    %128 = vector.load %arg2[%c638, %c0_53] : memref<1024x128xf32, #tpu.memory_space<vmem>>, vector<1x128xf32>
    %c640 = arith.constant 640 : index
    %c0_54 = arith.constant 0 : index
    %129 = vector.load %arg2[%c640, %c0_54] : memref<1024x128xf32, #tpu.memory_space<vmem>>, vector<32x128xf32>
    %c672 = arith.constant 672 : index
    %c0_55 = arith.constant 0 : index
    %130 = vector.load %arg2[%c672, %c0_55] : memref<1024x128xf32, #tpu.memory_space<vmem>>, vector<32x128xf32>
    %c704 = arith.constant 704 : index
    %c0_56 = arith.constant 0 : index
    %131 = vector.load %arg2[%c704, %c0_56] : memref<1024x128xf32, #tpu.memory_space<vmem>>, vector<32x128xf32>
    %c736 = arith.constant 736 : index
    %c0_57 = arith.constant 0 : index
    %132 = vector.load %arg2[%c736, %c0_57] : memref<1024x128xf32, #tpu.memory_space<vmem>>, vector<32x128xf32>
    %c768 = arith.constant 768 : index
    %c0_58 = arith.constant 0 : index
    %133 = vector.load %arg2[%c768, %c0_58] : memref<1024x128xf32, #tpu.memory_space<vmem>>, vector<128x32xf32>
    %c896 = arith.constant 896 : index
    %c0_59 = arith.constant 0 : index
    %134 = vector.load %arg2[%c896, %c0_59] : memref<1024x128xf32, #tpu.memory_space<vmem>>, vector<128x32xf32>
    %cst_60 = arith.constant dense<0.000000e+00> : vector<16xf32>
    %135 = vector.multi_reduction <add>, %121, %cst_60 [1] : vector<16x32xf32> to vector<16xf32>
    %136 = vector.shape_cast %135 : vector<16xf32> to vector<16x1xf32>
    %cst_61 = arith.constant 3.200000e+01 : f32
    %137 = vector.broadcast %cst_61 : f32 to vector<16x1xf32>
    %138 = arith.divf %136, %137 : vector<16x1xf32>
    %139 = vector.broadcast %138 : vector<16x1xf32> to vector<16x32xf32>
    %140 = arith.subf %121, %139 : vector<16x32xf32>
    %141 = arith.mulf %140, %140 : vector<16x32xf32>
    %cst_62 = arith.constant dense<0.000000e+00> : vector<16xf32>
    %142 = vector.multi_reduction <add>, %141, %cst_62 [1] : vector<16x32xf32> to vector<16xf32>
    %143 = vector.shape_cast %142 : vector<16xf32> to vector<16x1xf32>
    %cst_63 = arith.constant 3.200000e+01 : f32
    %144 = vector.broadcast %cst_63 : f32 to vector<16x1xf32>
    %145 = arith.divf %143, %144 : vector<16x1xf32>
    %146 = vector.broadcast %138 : vector<16x1xf32> to vector<16x32xf32>
    %147 = arith.subf %121, %146 : vector<16x32xf32>
    %cst_64 = arith.constant 9.99999974E-6 : f32
    %148 = vector.broadcast %cst_64 : f32 to vector<16x1xf32>
    %149 = arith.addf %145, %148 : vector<16x1xf32>
    %150 = math.rsqrt %149 : vector<16x1xf32>
    %151 = vector.broadcast %150 : vector<16x1xf32> to vector<16x32xf32>
    %152 = arith.mulf %147, %151 : vector<16x32xf32>
    %153 = vector.broadcast %122 : vector<1x32xf32> to vector<16x32xf32>
    %154 = arith.mulf %152, %153 : vector<16x32xf32>
    %155 = vector.broadcast %123 : vector<1x32xf32> to vector<16x32xf32>
    %156 = arith.addf %154, %155 : vector<16x32xf32>
    %cst_65 = arith.constant dense<0.000000e+00> : vector<16x128xf32>
    %157 = tpu.matmul %156, %129, %cst_65 {dimension_numbers = #tpu.dot_dimension_numbers<[1], [0], [0], [1], [0, 0, 1, 1], [], []>} : vector<16x32xf32>, vector<32x128xf32>, vector<16x128xf32> -> vector<16x128xf32>
    %cst_66 = arith.constant dense<0.000000e+00> : vector<16x128xf32>
    %158 = tpu.matmul %156, %130, %cst_66 {dimension_numbers = #tpu.dot_dimension_numbers<[1], [0], [0], [1], [0, 0, 1, 1], [], []>} : vector<16x32xf32>, vector<32x128xf32>, vector<16x128xf32> -> vector<16x128xf32>
    %cst_67 = arith.constant dense<0.000000e+00> : vector<16x128xf32>
    %159 = tpu.matmul %156, %131, %cst_67 {dimension_numbers = #tpu.dot_dimension_numbers<[1], [0], [0], [1], [0, 0, 1, 1], [], []>} : vector<16x32xf32>, vector<32x128xf32>, vector<16x128xf32> -> vector<16x128xf32>
    %c8_i32_68 = arith.constant 8 : i32
    %160 = tpu.dynamic_rotate %158 by %c8_i32_68 dim 0 : vector<16x128xf32>, i32 -> vector<16x128xf32>
    %c8_i32_69 = arith.constant 8 : i32
    %161 = tpu.dynamic_rotate %159 by %c8_i32_69 dim 0 : vector<16x128xf32>, i32 -> vector<16x128xf32>
    %162 = arith.mulf %157, %158 : vector<16x128xf32>
    %cst_70 = arith.constant dense<0.000000e+00> : vector<16x2xf32>
    %163 = tpu.matmul %162, %11, %cst_70 {dimension_numbers = #tpu.dot_dimension_numbers<[1], [0], [0], [1], [0, 0, 1, 1], [], []>} : vector<16x128xf32>, vector<128x2xf32>, vector<16x2xf32> -> vector<16x2xf32>
    %164 = vector.broadcast %13 : f32 to vector<16x2xf32>
    %165 = arith.mulf %163, %164 : vector<16x2xf32>
    %166 = arith.mulf %157, %160 : vector<16x128xf32>
    %cst_71 = arith.constant dense<0.000000e+00> : vector<16x2xf32>
    %167 = tpu.matmul %166, %11, %cst_71 {dimension_numbers = #tpu.dot_dimension_numbers<[1], [0], [0], [1], [0, 0, 1, 1], [], []>} : vector<16x128xf32>, vector<128x2xf32>, vector<16x2xf32> -> vector<16x2xf32>
    %168 = vector.broadcast %13 : f32 to vector<16x2xf32>
    %169 = arith.mulf %167, %168 : vector<16x2xf32>
    %170 = arith.maximumf %165, %169 : vector<16x2xf32>
    %171 = arith.subf %165, %170 : vector<16x2xf32>
    %172 = math.exp %171 : vector<16x2xf32>
    %173 = arith.subf %169, %170 : vector<16x2xf32>
    %174 = math.exp %173 : vector<16x2xf32>
    %175 = arith.addf %172, %174 : vector<16x2xf32>
    %176 = tpu.reciprocal %175 {approx = true} : vector<16x2xf32> -> vector<16x2xf32>
    %177 = arith.mulf %172, %176 : vector<16x2xf32>
    %cst_72 = arith.constant dense<0.000000e+00> : vector<16x128xf32>
    %178 = tpu.matmul %177, %12, %cst_72 {dimension_numbers = #tpu.dot_dimension_numbers<[1], [0], [0], [1], [0, 0, 1, 1], [], []>} : vector<16x2xf32>, vector<2x128xf32>, vector<16x128xf32> -> vector<16x128xf32>
    %179 = arith.mulf %174, %176 : vector<16x2xf32>
    %cst_73 = arith.constant dense<0.000000e+00> : vector<16x128xf32>
    %180 = tpu.matmul %179, %12, %cst_73 {dimension_numbers = #tpu.dot_dimension_numbers<[1], [0], [0], [1], [0, 0, 1, 1], [], []>} : vector<16x2xf32>, vector<2x128xf32>, vector<16x128xf32> -> vector<16x128xf32>
    %181 = arith.mulf %178, %159 : vector<16x128xf32>
    %182 = arith.mulf %180, %161 : vector<16x128xf32>
    %183 = arith.addf %181, %182 : vector<16x128xf32>
    %cst_74 = arith.constant dense<0.000000e+00> : vector<16x32xf32>
    %184 = tpu.matmul %183, %133, %cst_74 {dimension_numbers = #tpu.dot_dimension_numbers<[1], [0], [0], [1], [0, 0, 1, 1], [], []>} : vector<16x128xf32>, vector<128x32xf32>, vector<16x32xf32> -> vector<16x32xf32>
    %185 = arith.addf %121, %184 : vector<16x32xf32>
    %186 = vector.broadcast %124 : vector<1x32xf32> to vector<16x32xf32>
    %187 = arith.addf %185, %186 : vector<16x32xf32>
    %cst_75 = arith.constant dense<0.000000e+00> : vector<16xf32>
    %188 = vector.multi_reduction <add>, %187, %cst_75 [1] : vector<16x32xf32> to vector<16xf32>
    %189 = vector.shape_cast %188 : vector<16xf32> to vector<16x1xf32>
    %cst_76 = arith.constant 3.200000e+01 : f32
    %190 = vector.broadcast %cst_76 : f32 to vector<16x1xf32>
    %191 = arith.divf %189, %190 : vector<16x1xf32>
    %192 = vector.broadcast %191 : vector<16x1xf32> to vector<16x32xf32>
    %193 = arith.subf %187, %192 : vector<16x32xf32>
    %194 = arith.mulf %193, %193 : vector<16x32xf32>
    %cst_77 = arith.constant dense<0.000000e+00> : vector<16xf32>
    %195 = vector.multi_reduction <add>, %194, %cst_77 [1] : vector<16x32xf32> to vector<16xf32>
    %196 = vector.shape_cast %195 : vector<16xf32> to vector<16x1xf32>
    %cst_78 = arith.constant 3.200000e+01 : f32
    %197 = vector.broadcast %cst_78 : f32 to vector<16x1xf32>
    %198 = arith.divf %196, %197 : vector<16x1xf32>
    %199 = vector.broadcast %191 : vector<16x1xf32> to vector<16x32xf32>
    %200 = arith.subf %187, %199 : vector<16x32xf32>
    %cst_79 = arith.constant 9.99999974E-6 : f32
    %201 = vector.broadcast %cst_79 : f32 to vector<16x1xf32>
    %202 = arith.addf %198, %201 : vector<16x1xf32>
    %203 = math.rsqrt %202 : vector<16x1xf32>
    %204 = vector.broadcast %203 : vector<16x1xf32> to vector<16x32xf32>
    %205 = arith.mulf %200, %204 : vector<16x32xf32>
    %206 = vector.broadcast %125 : vector<1x32xf32> to vector<16x32xf32>
    %207 = arith.mulf %205, %206 : vector<16x32xf32>
    %208 = vector.broadcast %126 : vector<1x32xf32> to vector<16x32xf32>
    %209 = arith.addf %207, %208 : vector<16x32xf32>
    %cst_80 = arith.constant dense<0.000000e+00> : vector<16x128xf32>
    %210 = tpu.matmul %209, %132, %cst_80 {dimension_numbers = #tpu.dot_dimension_numbers<[1], [0], [0], [1], [0, 0, 1, 1], [], []>} : vector<16x32xf32>, vector<32x128xf32>, vector<16x128xf32> -> vector<16x128xf32>
    %211 = vector.broadcast %128 : vector<1x128xf32> to vector<16x128xf32>
    %212 = arith.addf %210, %211 : vector<16x128xf32>
    %cst_81 = arith.constant 5.000000e-01 : f32
    %213 = vector.broadcast %cst_81 : f32 to vector<16x128xf32>
    %214 = arith.mulf %213, %212 : vector<16x128xf32>
    %cst_82 = arith.constant 4.471500e-02 : f32
    %215 = vector.broadcast %cst_82 : f32 to vector<16x128xf32>
    %216 = arith.mulf %215, %212 : vector<16x128xf32>
    %217 = arith.mulf %216, %212 : vector<16x128xf32>
    %218 = arith.mulf %217, %212 : vector<16x128xf32>
    %219 = arith.addf %212, %218 : vector<16x128xf32>
    %cst_83 = arith.constant 0.797884583 : f32
    %220 = vector.broadcast %cst_83 : f32 to vector<16x128xf32>
    %221 = arith.mulf %220, %219 : vector<16x128xf32>
    %222 = math.tanh %221 : vector<16x128xf32>
    %cst_84 = arith.constant 1.000000e+00 : f32
    %223 = vector.broadcast %cst_84 : f32 to vector<16x128xf32>
    %224 = arith.addf %223, %222 : vector<16x128xf32>
    %225 = arith.mulf %214, %224 : vector<16x128xf32>
    %cst_85 = arith.constant dense<0.000000e+00> : vector<16x32xf32>
    %226 = tpu.matmul %225, %134, %cst_85 {dimension_numbers = #tpu.dot_dimension_numbers<[1], [0], [0], [1], [0, 0, 1, 1], [], []>} : vector<16x128xf32>, vector<128x32xf32>, vector<16x32xf32> -> vector<16x32xf32>
    %227 = arith.addf %187, %226 : vector<16x32xf32>
    %228 = vector.broadcast %127 : vector<1x32xf32> to vector<16x32xf32>
    %229 = arith.addf %227, %228 : vector<16x32xf32>
    %c2 = arith.constant 2 : index
    %c0_86 = arith.constant 0 : index
    %230 = vector.load %arg2[%c2, %c0_86] : memref<1024x128xf32, #tpu.memory_space<vmem>>, vector<1x32xf32>
    %c3 = arith.constant 3 : index
    %c0_87 = arith.constant 0 : index
    %231 = vector.load %arg2[%c3, %c0_87] : memref<1024x128xf32, #tpu.memory_space<vmem>>, vector<1x32xf32>
    %cst_88 = arith.constant dense<0.000000e+00> : vector<16xf32>
    %232 = vector.multi_reduction <add>, %229, %cst_88 [1] : vector<16x32xf32> to vector<16xf32>
    %233 = vector.shape_cast %232 : vector<16xf32> to vector<16x1xf32>
    %cst_89 = arith.constant 3.200000e+01 : f32
    %234 = vector.broadcast %cst_89 : f32 to vector<16x1xf32>
    %235 = arith.divf %233, %234 : vector<16x1xf32>
    %236 = vector.broadcast %235 : vector<16x1xf32> to vector<16x32xf32>
    %237 = arith.subf %229, %236 : vector<16x32xf32>
    %238 = arith.mulf %237, %237 : vector<16x32xf32>
    %cst_90 = arith.constant dense<0.000000e+00> : vector<16xf32>
    %239 = vector.multi_reduction <add>, %238, %cst_90 [1] : vector<16x32xf32> to vector<16xf32>
    %240 = vector.shape_cast %239 : vector<16xf32> to vector<16x1xf32>
    %cst_91 = arith.constant 3.200000e+01 : f32
    %241 = vector.broadcast %cst_91 : f32 to vector<16x1xf32>
    %242 = arith.divf %240, %241 : vector<16x1xf32>
    %243 = vector.broadcast %235 : vector<16x1xf32> to vector<16x32xf32>
    %244 = arith.subf %229, %243 : vector<16x32xf32>
    %cst_92 = arith.constant 9.99999974E-6 : f32
    %245 = vector.broadcast %cst_92 : f32 to vector<16x1xf32>
    %246 = arith.addf %242, %245 : vector<16x1xf32>
    %247 = math.rsqrt %246 : vector<16x1xf32>
    %248 = vector.broadcast %247 : vector<16x1xf32> to vector<16x32xf32>
    %249 = arith.mulf %244, %248 : vector<16x32xf32>
    %250 = vector.broadcast %230 : vector<1x32xf32> to vector<16x32xf32>
    %251 = arith.mulf %249, %250 : vector<16x32xf32>
    %252 = vector.broadcast %231 : vector<1x32xf32> to vector<16x32xf32>
    %253 = arith.addf %251, %252 : vector<16x32xf32>
    %254 = vector.extract_strided_slice %253 {offsets = [0, 0], sizes = [8, 32], strides = [1, 1]} : vector<16x32xf32> to vector<8x32xf32>
    %c72 = arith.constant 72 : index
    %c0_93 = arith.constant 0 : index
    %255 = vector.load %arg2[%c72, %c0_93] : memref<1024x128xf32, #tpu.memory_space<vmem>>, vector<32x32xf32>
    %cst_94 = arith.constant dense<0.000000e+00> : vector<8x32xf32>
    %256 = tpu.matmul %254, %255, %cst_94 {dimension_numbers = #tpu.dot_dimension_numbers<[1], [0], [0], [1], [0, 0, 1, 1], [], []>} : vector<8x32xf32>, vector<32x32xf32>, vector<8x32xf32> -> vector<8x32xf32>
    %c4 = arith.constant 4 : index
    %c0_95 = arith.constant 0 : index
    %257 = vector.load %arg2[%c4, %c0_95] : memref<1024x128xf32, #tpu.memory_space<vmem>>, vector<1x32xf32>
    %258 = vector.broadcast %257 : vector<1x32xf32> to vector<8x32xf32>
    %259 = arith.addf %256, %258 : vector<8x32xf32>
    %c0_96 = arith.constant 0 : index
    %c0_97 = arith.constant 0 : index
    %260 = vector.load %arg3[%c0_96, %c0_97] : memref<8x32xf32, #tpu.memory_space<vmem>>, vector<8x32xf32>
    tpu.vector_store %arg3[%c0_96, %c0_97], %259 {strides = array<i32>} : memref<8x32xf32, #tpu.memory_space<vmem>>, vector<8x32xf32>,
    return
  }
  func.func @transform_0(%arg0: i32) -> (i32, i32) {
    %c0_i32 = arith.constant 0 : i32
    %c0_i32_0 = arith.constant 0 : i32
    return %arg0, %c0_i32 : i32, i32
  }
  func.func @transform_1(%arg0: i32) -> (i32, i32) {
    %c0_i32 = arith.constant 0 : i32
    %c0_i32_0 = arith.constant 0 : i32
    %c0_i32_1 = arith.constant 0 : i32
    return %c0_i32, %c0_i32_0 : i32, i32
  }
  func.func @transform_2(%arg0: i32) -> (i32, i32) {
    %c0_i32 = arith.constant 0 : i32
    %c0_i32_0 = arith.constant 0 : i32
    return %arg0, %c0_i32 : i32, i32
  }
}

</mosaic_0001>

<bundles_post_ra>
// kernel: transition_forward.1
= control target key start
LH: loop header
LB: loop body
LE: loop exit
PB: predicated region body
PF: predicated region fallthrough
CT: control target
= control target key end

     0   :  { %7 = vsyncpa [#allocation3], 0  ;;  %s4016_s0 = inlined_call_operand.vmem [shape: f32[16,64], index: 0, kind: input, shape index: {}]   ;;  %s4017_s1 = inlined_call_operand.hbm [shape: f32[1024,128], index: 1, kind: input, shape index: {}]   ;;  %s4018_s2 = inlined_call_operand.hbm [shape: f32[16,32], index: 2, kind: output, shape index: {}]  }
   0x1   :  { %8 = vsyncpa [#allocation4], 0 }
   0x2   :  { %10 = vsyncpa [#allocation4 + $0x1], 0  ;;  %s3678_s9 = smov 0   ;;  %s3680_s10 = smov 0  }
   0x3   :  { %s3682_s11 = smov 0   ;;  %s3684_s12 = smov 0  }
   0x4 LB: > { %s3699_s13 = sadd.s32 4294967295, %s3654_s12   ;;  %s2420_s14 = sadd.s32 4294967294, %s3654_s12   ;;  %s3654_s12 = sphi %s3684_s12, %s4034_s12   ;;  %s3650_s11 = sphi %s3682_s11, %s4033_s11   ;;  %s3646_s10 = sphi %s3680_s10, %s4032_s10   ;;  %s3642_s9 = sphi %s3678_s9, %s4031_s9  }
   0x5   : > { %s3703_s15 = sadd.s32 1, %s3654_s12   ;;  %s70_s16 = sadd.s32 1, %s3650_s11 }
   0x6   : > { %s67_s17 = ssub.s32 %s3654_s12, %s3703_s15  ;;  %p80_p0 = scmp.ne.s32.totalorder %s3650_s11, %s3646_s10 }
   0x7   : > { %p68_p1 = scmp.eq.s32.totalorder %s67_s17, 0  ;;  %p81_p2 = scmp.eq.s32.totalorder %s3699_s13, 1 }
   0x8   : > { %p86_p3 = scmp.ne.s32.totalorder %s3646_s10, %s3642_s9  ;;  %p87_p4 = scmp.eq.s32.totalorder %s2420_s14, 1 }
   0x9   : > { %s3714_s18 = scalar_select %p68_p1, %s3650_s11, %s70_s16  }
   0xa   : > { %p3716_p5 = por %p81_p2, %p80_p0  ;;  %p3720_p6 = por %p87_p4, %p86_p3 }
   0xb   : > { %p2421_p7 = scmp.ge.s32.totalorder %s3654_s12, 1  ;;  %p94_p8 = scmp.lt.s32.totalorder %s3654_s12, 3 }
   0xc   : > { %s4022_s19 = scalar_select %p3716_p5, 1, 0 }
   0xd   : > { %s4023_s20 = scalar_select %p3720_p6, 1, 0 }
   0xe   : > { %p4019_p9 = scmp.eq.s32.totalorder %s3699_s13, 0  ;;  %p3727_p10 = pnand %p2421_p7, %p94_p8 }
   0xf   : > { %s3656_s22 = smov [#allocation2]   ;;  %s3560_s27 = scalar_lea.hbm %s4017_s1, 16384 }
  0x10   : > { %s4024_s21 = scalar_select %p3727_p10, 1, 0 }
  0x11   : > { %s106_s23 = sshll.u32 %s3656_s22, 4  ;;  %p3461_p11 = pneg %p3727_p10  ;;  %s107_s23 = int_to_ptr.vmem [resolvable:$true] %s106_s23 }
  0x12   : > { %p3561_p13 = scmp.ne.s32.totalorder %s4017_s1, %s3560_s27  ;;  %p3567_p3 = scmp.lt.u32.totalorder %s3560_s27, %s4017_s1 }
  0x13   : > { %p3735_p12 = pnand %p4019_p9, %p3461_p11 }
  0x15   : > { %p3562_p0 = pneg %p3735_p12 }
  0x17   : > { %p3563_p1 = pnand %p3562_p0, %p3561_p13 }
  0x19   : > { %p3564_p2 = pneg %p3563_p1 }
  0x1b   : > { %p3569_p4 = pnand %p3567_p3, %p3564_p2 }
  0x1d   : > { %3572 = shalt.err (!%p3569_p4)
}
  0x1e   : > { %s3573_s4 = scalar_lea.vmem %s107_s23, 16384  ;;  %p3581_p9 = scmp.lt.s32.totalorder %s107_s23, %s107_s23 }
  0x1f   : > { %p3574_p7 = scmp.ne.s32.totalorder %s107_s23, %s3573_s4  ;;  %p3582_p6 = scmp.lt.s32.totalorder %s3573_s4, %s3573_s4 }
  0x21   : > { %p3576_p8 = pnand %p3574_p7, %p3562_p0  ;;  %p3583_p5 = por %p3582_p6, %p3581_p9 }
  0x23   : > { %p3577_p11 = pneg %p3576_p8 }
  0x25   : > { %p3584_p10 = pnand %p3583_p5, %p3577_p11 }
  0x27   : > { %3587 = shalt.err (!%p3584_p10)
}
  0x28   : > { %s3657_s5 = smov 128   ;;  %s3658_s6 = smov 8  }
  0x29   : > { %3464 = dma.hbm_to_vmem [thread:$0]  (!%p3735_p12), %s4017_s1, 16384, %s107_s23, [#allocation3], %s3657_s5, %s3657_s5, %s3658_s6  }
  0x2a   : > { %p4026_p13 = scmp.ne.s32.totalorder %s4024_s21, 0 }
  0x2b   : > { %p4027_p1 = scmp.eq.s32.totalorder (!%p4026_p13), %s3699_s13, 0 }
  0x2c   : > { %129 = sbr.rel (%p4026_p13) target bundleno = 4818 (0x12d2), region = 28 }
  0x33   : > { %3633 = dma.done.wait (%p4027_p1), [#allocation3], 16384   ;;  %p4028_p0 = pmov %p4027_p1 }
  0x34   : > { %p150_p5 = scmp.lt.s32.totalorder %s3699_s13, 1  ;;  %v3659_v0 = vmov 0.0|0.0   ;;  %vm3660_vm0 = vmmov 0   ;;  %v3661_v1 = vmov 0.0   ;;  %v161_v2 = vld [vmem:[#allocation2 + $0x8] sm:$0xff]  ;;  %v162_v3 = vld [vmem:[#allocation2 + $0x10] sm:$0xff] }
  0x35   : > { %3635 = vsyncadd (%p4028_p0), [#allocation3], 4294950912  ;;  %3117 = vmatprep.subr.bf16.mxu0 %v3659_v0  ;;  %2715 = vmatprep.mubr.msk.f32.mxu0 %vm3660_vm0, %v3661_v1  ;;  %v163_v4 = vld [vmem:[#allocation2 + $0x18] sm:$0xff]  ;;  %v3118_v5 = vpack.c.bf16 %v162_v3, %v161_v2  ;;  %v164_v6 = vld [vmem:[#allocation2 + $0x20] sm:$0xff]  ;;  %vm320_vm1 = vcmask 261120   ;;  %vm174_vm2 = vcmask 523264  }
  0x36   : > { %s151_s14 = scalar_select %p150_p5, %s3699_s13, 1  ;;  %v3121_v7 = vpack.c.bf16 %v164_v6, %v163_v4  ;;  %v2428_v9 = vld [vmem:[#allocation2] ss:$0 sm:$0xff]  ;;  %v165_v10 = vld [vmem:[#allocation2 + $0x28] sm:$0xff]  ;;  %v166_v11 = vld [vmem:[#allocation2 + $0x30] sm:$0xff]  ;;  %vm776_vm3 = vcmask 1041408  }
  0x37   : > { %3119 = vmatpush3.bf16.msra.mxu0 %v3118_v5  ;;  %v3124_v14 = vpack.c.bf16 %v166_v11, %v165_v10  ;;  %v167_v15 = vld [vmem:[#allocation2 + $0x38] sm:$0xff]  ;;  %v168_v16 = vld [vmem:[#allocation2 + $0x40] sm:$0xff]  ;;  %v2431_v32 = vld [vmem:[#allocation2 + $0xf0] ss:$0 sm:$0xff]  ;;  %vm769_vm4 = vcmask 15360   ;;  %s147_s23 = sand.u32 1, %s3646_s10  }
  0x38   : > { %s2427_s16 = sshll.u32 %s151_s14, 3  ;;  %3120 = vmatprep.subr.bf16.mxu0 %v3659_v0  ;;  %v3127_v17 = vpack.c.bf16 %v168_v16, %v167_v15  ;;  %v2429_v23 = vld [vmem:[#allocation2 + $0x1] ss:$0 sm:$0xff]  ;;  %v2432_v34 = vld [vmem:[#allocation2 + $0xf1] ss:$0 sm:$0xff]  ;;  %v272_v42 = vld [vmem:[#allocation2 + $0xf8] sm:$0xff] }
  0x39   : > { %s153_s22 = scalar_lea.vmem %s4016_s0, %s2427_s16  ;;  %v273_v43 = vld [vmem:[#allocation2 + $0x100] sm:$0xff]  ;;  %v280_v44 = vld [vmem:[#allocation2 + $0x138] sm:$0xff]  ;;  %v274_v47 = vld [vmem:[#allocation2 + $0x108] sm:$0xff]  ;;  %s2426_s24 = sshll.u32 %s147_s23, 3 }
  0x3a   : > { %v154_v8 = vld [vmem:[%s153_s22] sm:$0xff]  ;;  %v3129_v45 = vpack.c.bf16 %v273_v43, %v272_v42  ;;  %v275_v48 = vld [vmem:[#allocation2 + $0x110] sm:$0xff]  ;;  %v282_v51 = vld [vmem:[#allocation2 + $0x148] sm:$0xff]  ;;  %s2478_s25 = sshll.u32 %s3699_s13, 7  ;;  %s149_s26 = scalar_lea.vmem [#allocation5], %s2426_s24 }
  0x3b   : > { %v3770_v12 = vadd.f32 %v2428_v9, %v154_v8  ;;  %3122 = vmatpush3.bf16.msra.mxu0 %v3121_v7  ;;  %v281_v46 = vld [vmem:[#allocation2 + $0x140] sm:$0xff]  ;;  %v3133_v50 = vpack.c.bf16 %v275_v48, %v274_v47  ;;  %v283_v52 = vld [vmem:[#allocation2 + $0x150] sm:$0xff]  ;;  %v276_v53 = vld [vmem:[#allocation2 + $0x118] sm:$0xff]  ;;  %s2349_s27 = sshll.u32 %s149_s26, 4  ;;  %s3973_s30 = scalar_lea.hbm %s4018_s2, %s2478_s25  ;;  %s3975_s27 = int_to_ptr.vmem [resolvable:$true] %s2349_s27 }
  0x3c   : > { %3123 = vmatprep.subr.bf16.mxu0 %v3659_v0  ;;  %v3145_v49 = vpack.c.bf16 %v281_v46, %v280_v44  ;;  %3130 = vmatprep.subr.bf16.mxu1 %v3129_v45  ;;  %v3149_v54 = vpack.c.bf16 %v283_v52, %v282_v51  ;;  %v277_v55 = vld [vmem:[#allocation2 + $0x120] sm:$0xff]  ;;  %v248_v57 = vld [vmem:[#allocation2 + $0x68] sm:$0xff]  ;;  %v249_v58 = vld [vmem:[#allocation2 + $0x70] sm:$0xff]  ;;  %s2336_s3 = scalar_lea.sflag [#allocation4], %s147_s23  ;;  %s3588_s4 = scalar_lea.vmem %s3975_s27, 128 }
  0x3d   : > { %v321_v13 = vsel %vm320_vm1, %v3770_v12, 0.0  ;;  %3132 = vmatpush3.bf16.msra.mxu1 %v3129_v45  ;;  %v3137_v56 = vpack.c.bf16 %v277_v55, %v276_v53  ;;  %v3786_v59 = vpack.c.bf16 %v249_v58, %v248_v57  ;;  %v278_v3 = vld [vmem:[#allocation2 + $0x128] sm:$0xff]  ;;  %v279_v4 = vld [vmem:[#allocation2 + $0x130] sm:$0xff]  ;;  %v250_v6 = vld [vmem:[#allocation2 + $0x78] sm:$0xff]  ;;  %p3589_p6 = scmp.ne.s32.totalorder %s3975_s27, %s3588_s4  ;;  %p4029_p9 = scmp.ne.s32.totalorder %s4022_s19, 0 }
  0x3e   : > { %322 = vadd.xlane.f32.xlu0 %v321_v13  ;;  %3134 = vmatprep.subr.bf16.mxu1 %v3133_v50  ;;  %v251_v7 = vld [vmem:[#allocation2 + $0x80] sm:$0xff]  ;;  %v3141_v9 = vpack.c.bf16 %v279_v4, %v278_v3  ;;  %v252_v11 = vld [vmem:[#allocation2 + $0x88] sm:$0xff]  ;;  %v253_v13 = vld [vmem:[#allocation2 + $0x90] sm:$0xff]  ;;  %s3662_s13 = smov [#allocation5]  }
  0x3f   : > { %3125 = vmatpush3.bf16.msra.mxu0 %v3124_v14  ;;  %v3789_v10 = vpack.c.bf16 %v251_v7, %v250_v6  ;;  %v3796_v14 = vpack.c.bf16 %v253_v13, %v252_v11  ;;  %v254_v15 = vld [vmem:[#allocation2 + $0x98] sm:$0xff]  ;;  %v255_v16 = vld [vmem:[#allocation2 + $0xa0] sm:$0xff]  ;;  %v290_v44 = vld [vmem:[#allocation2 + $0x188] sm:$0xff]  ;;  %p3590_p10 = pnand %p3589_p6, %p4029_p9  ;;  %s3592_s5 = sshll.u32 %s3662_s13, 4  ;;  %s3593_s5 = int_to_ptr.vmem [resolvable:$false] %s3592_s5 }
  0x40   : > { %3126 = vmatprep.subr.bf16.mxu0 %v3659_v0  ;;  %v288_v42 = vld [vmem:[#allocation2 + $0x178] sm:$0xff]  ;;  %v289_v43 = vld [vmem:[#allocation2 + $0x180] sm:$0xff]  ;;  %v291_v46 = vld [vmem:[#allocation2 + $0x190] sm:$0xff]  ;;  %s3594_s6 = scalar_lea.vmem %s3593_s5, 256  ;;  %p3595_p2 = scmp.lt.s32.totalorder %s3975_s27, %s3593_s5 }
  0x41   : > { %3136 = vmatpush3.bf16.msra.mxu1 %v3133_v50  ;;  %v3217_v45 = vpack.c.bf16 %v289_v43, %v288_v42  ;;  %v3221_v47 = vpack.c.bf16 %v291_v46, %v290_v44  ;;  %v292_v48 = vld [vmem:[#allocation2 + $0x198] sm:$0xff]  ;;  %v294_v51 = vld [vmem:[#allocation2 + $0x1a8] sm:$0xff]  ;;  %v295_v52 = vld [vmem:[#allocation2 + $0x1b0] sm:$0xff]  ;;  %p3591_p12 = pneg %p3590_p10  ;;  %p3596_p3 = scmp.lt.s32.totalorder %s3594_s6, %s3588_s4 }
  0x42   : > { %3138 = vmatprep.subr.bf16.mxu1 %v3137_v56  ;;  %v3229_v53 = vpack.c.bf16 %v295_v52, %v294_v51  ;;  %v297_v55 = vld [vmem:[#allocation2 + $0x1c0] sm:$0xff]  ;;  %v298_v57 = vld [vmem:[#allocation2 + $0x1c8] sm:$0xff]  ;;  %v299_v58 = vld [vmem:[#allocation2 + $0x1d0] sm:$0xff] }
  0x43   : > { %3128 = vmatpush3.bf16.msra.mxu0 %v3127_v17  ;;  %v3801_v17 = vpack.c.bf16 %v255_v16, %v254_v15  ;;  %v301_v42 = vld [vmem:[#allocation2 + $0x1e0] sm:$0xff]  ;;  %v302_v44 = vld [vmem:[#allocation2 + $0x1e8] sm:$0xff]  ;;  %p3597_p4 = por %p3596_p3, %p3595_p2 }
  0x44   : > { %3146 = vmatprep.subr.bf16.mxu0 %v3145_v49 }
  0x45   : > { %p3598_p7 = pnand %p3597_p4, %p3591_p12 }
  0x46   : > { %2716 = vmatmul.mubr.msk.f32.vlgmr.msra.gmra.mrb[0].mxu0 %vm174_vm2, %v154_v8 }
  0x47   : > { %3148 = vmatpush3.bf16.msra.mxu0 %v3145_v49  ;;  %v293_v49 = vld [vmem:[#allocation2 + $0x1a0] sm:$0xff] }
  0x48   : > { %3150 = vmatprep.subr.bf16.mxu0 %v3149_v54  ;;  %v3225_v50 = vpack.c.bf16 %v293_v49, %v292_v48 }
  0x4b   : > { %3152 = vmatpush3.bf16.msra.mxu0 %v3149_v54  ;;  %v296_v54 = vld [vmem:[#allocation2 + $0x1b8] sm:$0xff] }
  0x4c   : > { %3186 = vmatprep.subr.bf16.mxu0 %v3786_v59 }
  0xcb   : > { %v323_v18 = vpop.xlane.xlu0 %322 }
  0xcc   : > { %v328_v19 = vmul.f32 0.03125, %v323_v18  ;;  %v256_v18 = vld [vmem:[#allocation2 + $0xa8] sm:$0xff] }
  0xce   : > { %v330_v20 = vsub.f32 %v3770_v12, %v328_v19  ;;  %v257_v19 = vld [vmem:[#allocation2 + $0xb0] sm:$0xff] }
  0xd0   : > { %v332_v21 = vmul.f32 %v330_v20, %v330_v20 }
  0xd2   : > { %v334_v22 = vsel %vm320_vm1, %v332_v21, 0.0  ;;  %v258_v21 = vld [vmem:[#allocation2 + $0xb8] sm:$0xff] }
  0xd3   : > { %335 = vadd.xlane.f32.xlu1 %v334_v22  ;;  %v259_v22 = vld [vmem:[#allocation2 + $0xc0] sm:$0xff] }
 0x119   : > { %v244_v24 = vpop.f32.mrb[0].mxu0 }
 0x11a   : > { %v3778_v25 = vadd.f32 %v2429_v23, %v244_v24  ;;  %v2717_v26 = vpop.f32.mrb[1].mxu0  ;;  %v3814_v23 = vpack.c.bf16 %v259_v22, %v258_v21  ;;  %v260_v24 = vld [vmem:[#allocation2 + $0xc8] sm:$0xff] }
 0x11b   : > { %v261_v26 = vld [vmem:[#allocation2 + $0xd0] sm:$0xff] }
 0x11c   : > { %v324_v27 = vsel %vm320_vm1, %v3778_v25, 0.0 }
 0x11d   : > { %325 = vadd.xlane.f32.xlu0 %v324_v27  ;;  %v3826_v27 = vpack.c.bf16 %v261_v26, %v260_v24 }
 0x160   : > { %v336_v28 = vpop.xlane.xlu1 %335 }
 0x161   : > { %v340_v29 = vmul.f32 0.03125, %v336_v28  ;;  %v262_v28 = vld [vmem:[#allocation2 + $0xd8] sm:$0xff] }
 0x163   : > { %v342_v30 = vadd.f32 1e-05, %v340_v29  ;;  %v263_v29 = vld [vmem:[#allocation2 + $0xe0] sm:$0xff] }
 0x165   : > { %3510 = vrsqrt.f32 %v342_v30  ;;  %v3832_v30 = vpack.c.bf16 %v263_v29, %v262_v28 }
 0x16f   : > { %v3511_v31 = vpop.eup %3510 }
 0x170   : > { %v346_v33 = vmul.f32 %v3511_v31, %v330_v20  ;;  %v3808_v20 = vpack.c.bf16 %v257_v19, %v256_v18 }
 0x172   : > { %v352_v35 = vmul.f32 %v2431_v32, %v346_v33 }
 0x174   : > { %v358_v36 = vadd.f32 %v2432_v34, %v352_v35 }
 0x176   : > { %2726 = vmatprep.mubr.msk.f32.mxu1 %vm320_vm1, %v358_v36  ;;  %2748 = vmatprep.mubr.msk.f32.mxu0 %vm320_vm1, %v358_v36 }
 0x1aa   : > { %v326_v37 = vpop.xlane.xlu0 %325 }
 0x1ab   : > { %v329_v38 = vmul.f32 0.03125, %v326_v37 }
 0x1ad   : > { %v331_v39 = vsub.f32 %v3778_v25, %v329_v38 }
 0x1af   : > { %v333_v40 = vmul.f32 %v331_v39, %v331_v39 }
 0x1b1   : > { %v337_v41 = vsel %vm320_vm1, %v333_v40, 0.0 }
 0x1b2   : > { %338 = vadd.xlane.f32.xlu1 %v337_v41  ;;  %v3842_v41 = vld [vmem:[#allocation2 + $0xe8] sm:$0x3] }
 0x23f   : > { %v339_v60 = vpop.xlane.xlu1 %338 }
 0x240   : > { %v341_v61 = vmul.f32 0.03125, %v339_v60  ;;  %v3237_v60 = vpack.c.bf16 %v299_v58, %v298_v57  ;;  %v2445_v57 = vld [vmem:[#allocation2 + $0xf2] ss:$0 sm:$0xff] }
 0x242   : > { %v343_v62 = vadd.f32 1e-05, %v341_v61 }
 0x244   : > { %3512 = vrsqrt.f32 %v343_v62 }
 0x24e   : > { %v3513_v63 = vpop.eup %3512 }
 0x24f   : > { %v347_v2 = vmul.f32 %v3513_v63, %v331_v39 }
 0x251   : > { %v353_v5 = vmul.f32 %v2431_v32, %v347_v2 }
 0x253   : > { %v359_v8 = vadd.f32 %v2432_v34, %v353_v5 }
 0x255   : > { %2727 = vmatmul.mubr.msk.f32.vlgmr.msra.gmra.mrb[0].mxu1 %vm320_vm1, %v359_v8  ;;  %2749 = vmatmul.mubr.msk.f32.vlgmr.msra.gmra.mrb[2].mxu0 %vm320_vm1, %v359_v8 }
 0x256   : > { %3140 = vmatpush3.bf16.msra.mxu1 %v3137_v56  ;;  %2737 = vmatprep.mubr.msk.f32.mxu1 %vm320_vm1, %v358_v36  ;;  %v3233_v56 = vpack.c.bf16 %v297_v55, %v296_v54 }
 0x257   : > { %3142 = vmatprep.subr.bf16.mxu1 %v3141_v9  ;;  %3188 = vmatpush3.bf16.msra.mxu0 %v3786_v59 }
 0x258   : > { %3190 = vmatprep.subr.bf16.mxu0 %v3789_v10 }
 0x25a   : > { %3144 = vmatpush3.bf16.msra.mxu1 %v3141_v9 }
 0x25b   : > { %3154 = vmatprep.subr.bf16.mxu1 %v3786_v59  ;;  %3192 = vmatpush3.bf16.msra.mxu0 %v3789_v10 }
 0x25c   : > { %3194 = vmatprep.subr.bf16.mxu0 %v3796_v14 }
 0x25d   : > { %2738 = vmatmul.mubr.msk.f32.vlgmr.msra.gmra.mrb[2].mxu1 %vm320_vm1, %v359_v8 }
 0x25e   : > { %3156 = vmatpush3.bf16.msra.mxu1 %v3786_v59 }
 0x25f   : > { %3158 = vmatprep.subr.bf16.mxu1 %v3789_v10  ;;  %3196 = vmatpush3.bf16.msra.mxu0 %v3796_v14 }
 0x260   : > { %3198 = vmatprep.subr.bf16.mxu0 %v3801_v17 }
 0x262   : > { %3160 = vmatpush3.bf16.msra.mxu1 %v3789_v10 }
 0x263   : > { %3162 = vmatprep.subr.bf16.mxu1 %v3796_v14  ;;  %3200 = vmatpush3.bf16.msra.mxu0 %v3801_v17 }
 0x264   : > { %3202 = vmatprep.subr.bf16.mxu0 %v3808_v20 }
 0x266   : > { %3164 = vmatpush3.bf16.msra.mxu1 %v3796_v14 }
 0x267   : > { %3166 = vmatprep.subr.bf16.mxu1 %v3801_v17  ;;  %3204 = vmatpush3.bf16.msra.mxu0 %v3808_v20 }
 0x268   : > { %3206 = vmatprep.subr.bf16.mxu0 %v3814_v23 }
 0x26a   : > { %3168 = vmatpush3.bf16.msra.mxu1 %v3801_v17 }
 0x26b   : > { %3170 = vmatprep.subr.bf16.mxu1 %v3808_v20  ;;  %3208 = vmatpush3.bf16.msra.mxu0 %v3814_v23 }
 0x26c   : > { %3210 = vmatprep.subr.bf16.mxu0 %v3826_v27 }
 0x26e   : > { %3172 = vmatpush3.bf16.msra.mxu1 %v3808_v20 }
 0x26f   : > { %3174 = vmatprep.subr.bf16.mxu1 %v3814_v23  ;;  %3212 = vmatpush3.bf16.msra.mxu0 %v3826_v27 }
 0x270   : > { %3214 = vmatprep.subr.bf16.mxu0 %v3832_v30 }
 0x272   : > { %3176 = vmatpush3.bf16.msra.mxu1 %v3814_v23 }
 0x273   : > { %3178 = vmatprep.subr.bf16.mxu1 %v3826_v27  ;;  %3216 = vmatpush3.bf16.msra.mxu0 %v3832_v30 }
 0x274   : > { %3218 = vmatprep.subr.bf16.mxu0 %v3217_v45 }
 0x276   : > { %3180 = vmatpush3.bf16.msra.mxu1 %v3826_v27 }
 0x277   : > { %3182 = vmatprep.subr.bf16.mxu1 %v3832_v30 }
 0x27a   : > { %3184 = vmatpush3.bf16.msra.mxu1 %v3832_v30 }
 0x27b   : > { %2821 = vmatprep.subr.msk.mxu1 %vm776_vm3, %v3842_v41 }
 0x328   : > { %v2728_v31 = vpop.f32.mrb[0].mxu1  ;;  %v3838_v32 = vpop.f32.mrb[2].mxu0 }
 0x329   : > { %v432_v33 = vpop.f32.mrb[1].mxu1  ;;  %v3840_v34 = vpop.f32.mrb[3].mxu0 }
 0x330   : > { %v2739_v35 = vpop.f32.mrb[2].mxu1 }
 0x331   : > { %v592_v36 = vmul.f32 %v2739_v35, %v2728_v31  ;;  %v670_v37 = vmul.f32 %v2739_v35, %v432_v33  ;;  %v507_v38 = vpop.f32.mrb[3].mxu1 }
 0x332   : > { %v591_v39 = vmul.f32 %v507_v38, %v432_v33  ;;  %v671_v40 = vmul.f32 %v2728_v31, %v507_v38 }
 0x333   : > { %2818 = vmatprep.mubr.f32.mxu0 %v670_v37 }
 0x334   : > { %2783 = vmatprep.mubr.f32.mxu1 %v591_v39  ;;  %2819 = vmatmul.mubr.f32.vlgmr.msra.gmra.mrb[4].mxu0 %v671_v40  ;;  %v300_v40 = vld [vmem:[#allocation2 + $0x1d8] sm:$0xff] }
 0x335   : > { %2784 = vmatmul.mubr.f32.vlgmr.msra.gmra.mrb[4].mxu1 %v592_v36  ;;  %3220 = vmatpush3.bf16.msra.mxu0 %v3217_v45  ;;  %v3241_v43 = vpack.c.bf16 %v301_v42, %v300_v40  ;;  %v303_v45 = vld [vmem:[#allocation2 + $0x1f0] sm:$0xff] }
 0x336   : > { %2822 = vmatpush3.msk.msra.mxu1 %vm776_vm3, %v3842_v41  ;;  %3222 = vmatprep.subr.bf16.mxu0 %v3221_v47  ;;  %v3245_v46 = vpack.c.bf16 %v303_v45, %v302_v44 }
 0x337   : > { %2826 = vmatprep.subr.msk.mxu1 %vm776_vm3, %v3842_v41 }
 0x339   : > { %3224 = vmatpush3.bf16.msra.mxu0 %v3221_v47 }
 0x33a   : > { %3226 = vmatprep.subr.bf16.mxu0 %v3225_v50 }
 0x33d   : > { %3228 = vmatpush3.bf16.msra.mxu0 %v3225_v50 }
 0x33e   : > { %3230 = vmatprep.subr.bf16.mxu0 %v3229_v53 }
 0x341   : > { %3232 = vmatpush3.bf16.msra.mxu0 %v3229_v53 }
 0x342   : > { %3234 = vmatprep.subr.bf16.mxu0 %v3233_v56 }
 0x345   : > { %3236 = vmatpush3.bf16.msra.mxu0 %v3233_v56 }
 0x346   : > { %3238 = vmatprep.subr.bf16.mxu0 %v3237_v60 }
 0x349   : > { %3240 = vmatpush3.bf16.msra.mxu0 %v3237_v60 }
 0x34a   : > { %3242 = vmatprep.subr.bf16.mxu0 %v3241_v43 }
 0x34d   : > { %3244 = vmatpush3.bf16.msra.mxu0 %v3241_v43  ;;  %v2447_v43 = vld [vmem:[#allocation2 + $0xf4] ss:$0 sm:$0xff] }
 0x34e   : > { %3246 = vmatprep.subr.bf16.mxu0 %v3245_v46 }
 0x351   : > { %3248 = vmatpush3.bf16.msra.mxu0 %v3245_v46 }
 0x407   : > { %v2820_v61 = vpop.f32.mrb[4].mxu0 }
 0x408   : > { %v748_v62 = vmul.f32 0.125, %v2820_v61  ;;  %v2785_v63 = vpop.f32.mrb[4].mxu1  ;;  %v738_v2 = vpop.f32.mrb[5].mxu0 }
 0x409   : > { %v669_v3 = vmul.f32 0.125, %v2785_v63  ;;  %v747_v4 = vmul.f32 0.125, %v738_v2  ;;  %v659_v5 = vpop.f32.mrb[5].mxu1 }
 0x40a   : > { %v668_v6 = vmul.f32 0.125, %v659_v5 }
 0x40b   : > { %v750_v7 = vmax.f32 %v669_v3, %v748_v62 }
 0x40c   : > { %v749_v8 = vmax.f32 %v668_v6, %v747_v4 }
 0x40d   : > { %v752_v9 = vsub.f32 %v669_v3, %v750_v7  ;;  %v758_v11 = vsub.f32 %v748_v62, %v750_v7 }
 0x40e   : > { %v751_v13 = vsub.f32 %v668_v6, %v749_v8  ;;  %v757_v15 = vsub.f32 %v747_v4, %v749_v8 }
 0x40f   : > { %v755_v16 = vmul.f32 1.442695, %v752_v9  ;;  %v761_v18 = vmul.f32 1.442695, %v758_v11 }
 0x410   : > { %v753_v19 = vmul.f32 1.442695, %v751_v13  ;;  %v759_v21 = vmul.f32 1.442695, %v757_v15  ;;  %v284_v13 = vld [vmem:[#allocation2 + $0x158] sm:$0xff]  ;;  %v285_v15 = vld [vmem:[#allocation2 + $0x160] sm:$0xff] }
 0x411   : > { %3514 = vpow2.f32 %v755_v16  ;;  %v3249_v16 = vpack.c.bf16 %v285_v15, %v284_v13 }
 0x412   : > { %3516 = vpow2.f32 %v761_v18  ;;  %v286_v18 = vld [vmem:[#allocation2 + $0x168] sm:$0xff] }
 0x413   : > { %3518 = vpow2.f32 %v753_v19  ;;  %v287_v19 = vld [vmem:[#allocation2 + $0x170] sm:$0xff] }
 0x414   : > { %3520 = vpow2.f32 %v759_v21  ;;  %v3253_v21 = vpack.c.bf16 %v287_v19, %v286_v18 }
 0x41b   : > { %v3515_v22 = vpop.eup %3514 }
 0x41c   : > { %v3517_v24 = vpop.eup %3516 }
 0x41d   : > { %v3519_v26 = vpop.eup %3518  ;;  %v764_v28 = vadd.f32 %v3517_v24, %v3515_v22 }
 0x41e   : > { %v3521_v29 = vpop.eup %3520 }
 0x41f   : > { %3522 = vrcp.f32 %v764_v28  ;;  %v763_v31 = vadd.f32 %v3521_v29, %v3519_v26 }
 0x421   : > { %3524 = vrcp.f32 %v763_v31 }
 0x429   : > { %v3523_v33 = vpop.eup %3522 }
 0x42a   : > { %v768_v35 = vmul.f32 %v3523_v33, %v3515_v22  ;;  %v856_v36 = vmul.f32 %v3523_v33, %v3517_v24  ;;  %v304_v22 = vld [vmem:[#allocation2 + $0x1f8] sm:$0xff]  ;;  %v305_v24 = vld [vmem:[#allocation2 + $0x200] sm:$0xff] }
 0x42b   : > { %v3525_v37 = vpop.eup %3524 }
 0x42c   : > { %v767_v38 = vmul.f32 %v3525_v37, %v3519_v26  ;;  %v855_v39 = vmul.f32 %v3525_v37, %v3521_v29  ;;  %v3257_v26 = vpack.c.bf16 %v305_v24, %v304_v22 }
 0x42e   : > { %2823 = vmatprep.mubr.msk.f32.mxu1 %vm769_vm4, %v767_v38  ;;  %v2446_v38 = vld [vmem:[#allocation2 + $0xf3] ss:$0 sm:$0xff] }
 0x42f   : > { %2824 = vmatmul.mubr.msk.f32.vlgmr.msra.gmra.mrb[6].mxu1 %vm769_vm4, %v768_v35 }
 0x430   : > { %2827 = vmatpush3.msk.msra.mxu1 %vm776_vm3, %v3842_v41  ;;  %2828 = vmatprep.mubr.msk.f32.mxu1 %vm769_vm4, %v855_v39 }
 0x431   : > { %3250 = vmatprep.subr.bf16.mxu1 %v3249_v16 }
 0x433   : > { %2829 = vmatmul.mubr.msk.f32.vlgmr.msra.gmra.mrb[8].mxu1 %vm769_vm4, %v856_v36 }
 0x434   : > { %3252 = vmatpush3.bf16.msra.mxu1 %v3249_v16 }
 0x435   : > { %3254 = vmatprep.subr.bf16.mxu1 %v3253_v21 }
 0x438   : > { %3256 = vmatpush3.bf16.msra.mxu1 %v3253_v21 }
 0x439   : > { %3258 = vmatprep.subr.bf16.mxu1 %v3257_v26 }
 0x502   : > { %v2825_v47 = vpop.f32.mrb[6].mxu1 }
 0x503   : > { %v939_v48 = vmul.f32 %v2825_v47, %v3838_v32  ;;  %v846_v49 = vpop.f32.mrb[7].mxu1 }
 0x504   : > { %v938_v50 = vmul.f32 %v846_v49, %v3840_v34  ;;  %v307_v49 = vld [vmem:[#allocation2 + $0x210] sm:$0xff] }
 0x506   : > { %v2830_v51 = vpop.f32.mrb[8].mxu1 }
 0x507   : > { %v941_v52 = vmul.f32 %v2830_v51, %v3840_v34  ;;  %v929_v53 = vpop.f32.mrb[9].mxu1  ;;  %v308_v51 = vld [vmem:[#allocation2 + $0x218] sm:$0xff] }
 0x508   : > { %v940_v54 = vmul.f32 %v3838_v32, %v929_v53 }
 0x509   : > { %v943_v55 = vadd.f32 %v941_v52, %v939_v48  ;;  %v306_v48 = vld [vmem:[#allocation2 + $0x208] sm:$0xff]  ;;  %v309_v52 = vld [vmem:[#allocation2 + $0x220] sm:$0xff] }
 0x50a   : > { %v942_v56 = vadd.f32 %v940_v54, %v938_v50  ;;  %v3261_v50 = vpack.c.bf16 %v307_v49, %v306_v48  ;;  %v3265_v53 = vpack.c.bf16 %v309_v52, %v308_v51  ;;  %v310_v54 = vld [vmem:[#allocation2 + $0x228] sm:$0xff] }
 0x50c   : > { %2863 = vmatprep.mubr.f32.mxu0 %v942_v56 }
 0x50d   : > { %2864 = vmatmul.mubr.f32.vlgmr.msra.gmra.mrb[6].mxu0 %v943_v55  ;;  %v311_v55 = vld [vmem:[#allocation2 + $0x230] sm:$0xff] }
 0x50e   : > { %v3269_v56 = vpack.c.bf16 %v311_v55, %v310_v54 }
 0x5e0   : > { %v2865_v58 = vpop.f32.mrb[6].mxu0 }
 0x5e1   : > { %v1020_v60 = vadd.f32 %v2865_v58, %v3778_v25  ;;  %v1010_v61 = vpop.f32.mrb[7].mxu0  ;;  %v313_v58 = vld [vmem:[#allocation2 + $0x240] sm:$0xff] }
 0x5e2   : > { %v1019_v62 = vadd.f32 %v1010_v61, %v3770_v12 }
 0x5e3   : > { %v3862_v63 = vadd.f32 %v2445_v57, %v1020_v60  ;;  %v314_v60 = vld [vmem:[#allocation2 + $0x248] sm:$0xff] }
 0x5e4   : > { %v3864_v2 = vadd.f32 %v2445_v57, %v1019_v62  ;;  %v312_v57 = vld [vmem:[#allocation2 + $0x238] sm:$0xff]  ;;  %v315_v62 = vld [vmem:[#allocation2 + $0x250] sm:$0xff] }
 0x5e5   : > { %v1030_v34 = vsel %vm320_vm1, %v3862_v63, 0.0  ;;  %v3273_v61 = vpack.c.bf16 %v313_v58, %v312_v57  ;;  %v1258_v58 = vld [vmem:[#allocation2 + $0x280] sm:$0xff] }
 0x5e6   : > { %1031 = vadd.xlane.f32.xlu1 %v1030_v34  ;;  %v1027_v32 = vsel %vm320_vm1, %v3864_v2, 0.0  ;;  %v3277_v34 = vpack.c.bf16 %v315_v62, %v314_v60  ;;  %v1259_v60 = vld [vmem:[#allocation2 + $0x288] sm:$0xff]  ;;  %v1266_v62 = vld [vmem:[#allocation2 + $0x2c0] sm:$0xff] }
 0x5e7   : > { %1028 = vadd.xlane.f32.xlu0 %v1027_v32  ;;  %v316_v32 = vld [vmem:[#allocation2 + $0x258] sm:$0xff] }
 0x673   : > { %v1032_v3 = vpop.xlane.xlu1 %1031 }
 0x674   : > { %v1034_v4 = vmul.f32 0.03125, %v1032_v3  ;;  %v1029_v5 = vpop.xlane.xlu0 %1028  ;;  %v317_v3 = vld [vmem:[#allocation2 + $0x260] sm:$0xff] }
 0x675   : > { %v1033_v6 = vmul.f32 0.03125, %v1029_v5  ;;  %v318_v5 = vld [vmem:[#allocation2 + $0x268] sm:$0xff] }
 0x676   : > { %v1036_v25 = vsub.f32 %v3862_v63, %v1034_v4  ;;  %v3281_v4 = vpack.c.bf16 %v317_v3, %v316_v32  ;;  %v1260_v3 = vld [vmem:[#allocation2 + $0x290] sm:$0xff] }
 0x677   : > { %v1035_v12 = vsub.f32 %v3864_v2, %v1033_v6  ;;  %v319_v6 = vld [vmem:[#allocation2 + $0x270] sm:$0xff] }
 0x678   : > { %v1038_v7 = vmul.f32 %v1036_v25, %v1036_v25 }
 0x679   : > { %v1037_v8 = vmul.f32 %v1035_v12, %v1035_v12 }
 0x67a   : > { %v1042_v9 = vsel %vm320_vm1, %v1038_v7, 0.0 }
 0x67b   : > { %1043 = vadd.xlane.f32.xlu1 %v1042_v9  ;;  %v1039_v11 = vsel %vm320_vm1, %v1037_v8, 0.0 }
 0x67c   : > { %1040 = vadd.xlane.f32.xlu0 %v1039_v11 }
 0x708   : > { %v1044_v28 = vpop.xlane.xlu1 %1043 }
 0x709   : > { %v1046_v29 = vmul.f32 0.03125, %v1044_v28  ;;  %v1041_v31 = vpop.xlane.xlu0 %1040 }
 0x70a   : > { %v1045_v33 = vmul.f32 0.03125, %v1041_v31 }
 0x70b   : > { %v1048_v35 = vadd.f32 1e-05, %v1046_v29 }
 0x70c   : > { %v1047_v36 = vadd.f32 1e-05, %v1045_v33 }
 0x70d   : > { %3526 = vrsqrt.f32 %v1048_v35 }
 0x70e   : > { %3528 = vrsqrt.f32 %v1047_v36 }
 0x717   : > { %v3527_v37 = vpop.eup %3526 }
 0x718   : > { %v3529_v39 = vpop.eup %3528  ;;  %v1052_v40 = vmul.f32 %v3527_v37, %v1036_v25  ;;  %v3285_v25 = vpack.c.bf16 %v319_v6, %v318_v5  ;;  %v1268_v5 = vld [vmem:[#allocation2 + $0x2d0] sm:$0xff] }
 0x719   : > { %v1051_v42 = vmul.f32 %v3529_v39, %v1035_v12  ;;  %v2448_v12 = vld [vmem:[#allocation2 + $0xf6] ss:$0 sm:$0xff] }
 0x71a   : > { %v1058_v44 = vmul.f32 %v2446_v38, %v1052_v40  ;;  %v2451_v40 = vld [vmem:[#allocation2 + $0xf5] ss:$0 sm:$0xff] }
 0x71b   : > { %v1057_v45 = vmul.f32 %v2446_v38, %v1051_v42 }
 0x71c   : > { %v1064_v47 = vadd.f32 %v2447_v43, %v1058_v44 }
 0x71d   : > { %v1063_v46 = vadd.f32 %v2447_v43, %v1057_v45 }
 0x71f   : > { %2874 = vmatprep.mubr.msk.f32.mxu1 %vm320_vm1, %v1063_v46 }
 0x720   : > { %2875 = vmatmul.mubr.msk.f32.vlgmr.msra.gmra.mrb[10].mxu1 %vm320_vm1, %v1064_v47 }
 0x721   : > { %3260 = vmatpush3.bf16.msra.mxu1 %v3257_v26 }
 0x722   : > { %3262 = vmatprep.subr.bf16.mxu1 %v3261_v50 }
 0x725   : > { %3264 = vmatpush3.bf16.msra.mxu1 %v3261_v50 }
 0x726   : > { %3266 = vmatprep.subr.bf16.mxu1 %v3265_v53 }
 0x729   : > { %3268 = vmatpush3.bf16.msra.mxu1 %v3265_v53 }
 0x72a   : > { %3270 = vmatprep.subr.bf16.mxu1 %v3269_v56 }
 0x72d   : > { %3272 = vmatpush3.bf16.msra.mxu1 %v3269_v56 }
 0x72e   : > { %3274 = vmatprep.subr.bf16.mxu1 %v3273_v61 }
 0x731   : > { %3276 = vmatpush3.bf16.msra.mxu1 %v3273_v61  ;;  %v3289_v61 = vpack.c.bf16 %v1259_v60, %v1258_v58 }
 0x732   : > { %3278 = vmatprep.subr.bf16.mxu1 %v3277_v34 }
 0x733   : > { %3290 = vmatprep.subr.bf16.mxu0 %v3289_v61 }
 0x734   : > { %3292 = vmatpush3.bf16.msra.mxu0 %v3289_v61 }
 0x735   : > { %3280 = vmatpush3.bf16.msra.mxu1 %v3277_v34  ;;  %v1267_v34 = vld [vmem:[#allocation2 + $0x2c8] sm:$0xff] }
 0x736   : > { %3282 = vmatprep.subr.bf16.mxu1 %v3281_v4  ;;  %v3305_v32 = vpack.c.bf16 %v1267_v34, %v1266_v62 }
 0x739   : > { %3284 = vmatpush3.bf16.msra.mxu1 %v3281_v4  ;;  %v1261_v4 = vld [vmem:[#allocation2 + $0x298] sm:$0xff] }
 0x73a   : > { %3286 = vmatprep.subr.bf16.mxu1 %v3285_v25  ;;  %v3293_v6 = vpack.c.bf16 %v1261_v4, %v1260_v3 }
 0x73c   : > { %3294 = vmatprep.subr.bf16.mxu0 %v3293_v6 }
 0x73d   : > { %3288 = vmatpush3.bf16.msra.mxu1 %v3285_v25  ;;  %v1269_v25 = vld [vmem:[#allocation2 + $0x2d8] sm:$0xff]  ;;  %3296 = vmatpush3.bf16.msra.mxu0 %v3293_v6 }
 0x73e   : > { %3306 = vmatprep.subr.bf16.mxu1 %v3305_v32 }
 0x7f3   : > { %v2876_v7 = vpop.f32.mrb[10].mxu1 }
 0x7f4   : > { %v1147_v8 = vadd.f32 %v2876_v7, %v2448_v12  ;;  %v1141_v9 = vpop.f32.mrb[11].mxu1  ;;  %v1262_v7 = vld [vmem:[#allocation2 + $0x2a0] sm:$0xff] }
 0x7f5   : > { %v1142_v11 = vadd.f32 %v2448_v12, %v1141_v9  ;;  %v3309_v12 = vpack.c.bf16 %v1269_v25, %v1268_v5 }
 0x7f6   : > { %v1153_v13 = vmul.f32 0.044715, %v1147_v8  ;;  %v1151_v37 = vmul.f32 0.5, %v1147_v8 }
 0x7f7   : > { %v1152_v15 = vmul.f32 0.044715, %v1142_v11  ;;  %v1150_v35 = vmul.f32 0.5, %v1142_v11 }
 0x7f8   : > { %v1155_v16 = vmul.f32 %v1153_v13, %v1147_v8 }
 0x7f9   : > { %v1154_v18 = vmul.f32 %v1152_v15, %v1142_v11 }
 0x7fa   : > { %v1157_v19 = vmul.f32 %v1155_v16, %v1147_v8 }
 0x7fb   : > { %v1156_v21 = vmul.f32 %v1154_v18, %v1142_v11 }
 0x7fc   : > { %v1159_v22 = vadd.f32 %v1157_v19, %v1147_v8  ;;  %v1263_v8 = vld [vmem:[#allocation2 + $0x2a8] sm:$0xff] }
 0x7fd   : > { %v1158_v24 = vadd.f32 %v1156_v21, %v1142_v11  ;;  %v3297_v9 = vpack.c.bf16 %v1263_v8, %v1262_v7 }
 0x7fe   : > { %v1161_v26 = vmul.f32 0.7978846, %v1159_v22  ;;  %v2452_v22 = vld [vmem:[#allocation2 + $0x278] ss:$0 sm:$0xff] }
 0x7ff   : > { %v1160_v28 = vmul.f32 0.7978846, %v1158_v24  ;;  %3298 = vmatprep.subr.bf16.mxu0 %v3297_v9 }
 0x800   : > { %3530 = vtanh.f32 %v1161_v26 }
 0x801   : > { %3532 = vtanh.f32 %v1160_v28 }
 0x80a   : > { %v3531_v29 = vpop.eup %3530 }
 0x80b   : > { %v3533_v31 = vpop.eup %3532  ;;  %v1165_v33 = vadd.f32 1.0, %v3531_v29  ;;  %v2453_v29 = vld [vmem:[#allocation2 + $0x279] ss:$0 sm:$0xff] }
 0x80c   : > { %v1164_v36 = vadd.f32 1.0, %v3533_v31 }
 0x80d   : > { %v1167_v39 = vmul.f32 %v1165_v33, %v1151_v37 }
 0x80e   : > { %v1166_v38 = vmul.f32 %v1164_v36, %v1150_v35  ;;  %v1264_v35 = vld [vmem:[#allocation2 + $0x2b0] sm:$0xff]  ;;  %v1265_v36 = vld [vmem:[#allocation2 + $0x2b8] sm:$0xff] }
 0x810   : > { %2909 = vmatprep.mubr.f32.mxu1 %v1166_v38 }
 0x811   : > { %2910 = vmatmul.mubr.f32.vlgmr.msra.gmra.mrb[12].mxu1 %v1167_v39  ;;  %v3301_v39 = vpack.c.bf16 %v1265_v36, %v1264_v35  ;;  %v1284_v35 = vld [vmem:[#allocation2 + $0x350] sm:$0xff]  ;;  %v1285_v36 = vld [vmem:[#allocation2 + $0x358] sm:$0xff] }
 0x812   : > { %3308 = vmatpush3.bf16.msra.mxu1 %v3305_v32 }
 0x813   : > { %3310 = vmatprep.subr.bf16.mxu1 %v3309_v12 }
 0x816   : > { %3312 = vmatpush3.bf16.msra.mxu1 %v3309_v12 }
 0x817   : > { %3346 = vmatprep.subr.bf16.mxu1 %v3786_v59 }
 0x8e4   : > { %v2911_v42 = vpop.f32.mrb[12].mxu1 }
 0x8e5   : > { %v1244_v43 = vadd.f32 %v2911_v42, %v3862_v63  ;;  %v1234_v44 = vpop.f32.mrb[13].mxu1 }
 0x8e6   : > { %v1243_v45 = vadd.f32 %v1234_v44, %v3864_v2 }
 0x8e7   : > { %v3878_v46 = vadd.f32 %v2451_v40, %v1244_v43 }
 0x8e8   : > { %v3880_v47 = vadd.f32 %v2451_v40, %v1243_v45 }
 0x8e9   : > { %v1309_v48 = vsel %vm320_vm1, %v3878_v46, 0.0 }
 0x8ea   : > { %1310 = vadd.xlane.f32.xlu1 %v1309_v48  ;;  %v1306_v49 = vsel %vm320_vm1, %v3880_v47, 0.0 }
 0x8eb   : > { %1307 = vadd.xlane.f32.xlu0 %v1306_v49 }
 0x977   : > { %v1311_v50 = vpop.xlane.xlu1 %1310 }
 0x978   : > { %v1313_v51 = vmul.f32 0.03125, %v1311_v50  ;;  %v1308_v52 = vpop.xlane.xlu0 %1307 }
 0x979   : > { %v1312_v53 = vmul.f32 0.03125, %v1308_v52 }
 0x97a   : > { %v1315_v63 = vsub.f32 %v3878_v46, %v1313_v51 }
 0x97b   : > { %v1314_v2 = vsub.f32 %v3880_v47, %v1312_v53 }
 0x97c   : > { %v1317_v54 = vmul.f32 %v1315_v63, %v1315_v63 }
 0x97d   : > { %v1316_v55 = vmul.f32 %v1314_v2, %v1314_v2 }
 0x97e   : > { %v1321_v56 = vsel %vm320_vm1, %v1317_v54, 0.0 }
 0x97f   : > { %1322 = vadd.xlane.f32.xlu1 %v1321_v56  ;;  %v1318_v57 = vsel %vm320_vm1, %v1316_v55, 0.0 }
 0x980   : > { %1319 = vadd.xlane.f32.xlu0 %v1318_v57 }
 0xa0c   : > { %v1323_v11 = vpop.xlane.xlu1 %1322 }
 0xa0d   : > { %v1325_v13 = vmul.f32 0.03125, %v1323_v11  ;;  %v1320_v15 = vpop.xlane.xlu0 %1319  ;;  %v1277_v11 = vld [vmem:[#allocation2 + $0x318] sm:$0xff] }
 0xa0e   : > { %v1324_v16 = vmul.f32 0.03125, %v1320_v15 }
 0xa0f   : > { %v1327_v18 = vadd.f32 1e-05, %v1325_v13 }
 0xa10   : > { %v1326_v19 = vadd.f32 1e-05, %v1324_v16 }
 0xa11   : > { %3534 = vrsqrt.f32 %v1327_v18 }
 0xa12   : > { %3536 = vrsqrt.f32 %v1326_v19  ;;  %v1278_v19 = vld [vmem:[#allocation2 + $0x320] sm:$0xff] }
 0xa1b   : > { %v3535_v21 = vpop.eup %3534 }
 0xa1c   : > { %v3537_v24 = vpop.eup %3536  ;;  %v1331_v26 = vmul.f32 %v3535_v21, %v1315_v63  ;;  %v1279_v21 = vld [vmem:[#allocation2 + $0x328] sm:$0xff] }
 0xa1d   : > { %v1330_v28 = vmul.f32 %v3537_v24, %v1314_v2  ;;  %v1280_v24 = vld [vmem:[#allocation2 + $0x330] sm:$0xff] }
 0xa1e   : > { %v1337_v31 = vmul.f32 %v2452_v22, %v1331_v26  ;;  %v1281_v26 = vld [vmem:[#allocation2 + $0x338] sm:$0xff] }
 0xa1f   : > { %v1336_v33 = vmul.f32 %v2452_v22, %v1330_v28  ;;  %v3385_v22 = vpack.c.bf16 %v1279_v21, %v1278_v19  ;;  %v3389_v28 = vpack.c.bf16 %v1281_v26, %v1280_v24  ;;  %v2467_v19 = vld [vmem:[#allocation2 + $0x27b] ss:$0 sm:$0xff]  ;;  %v2468_v26 = vld [vmem:[#allocation2 + $0x27c] ss:$0 sm:$0xff] }
 0xa20   : > { %v1343_v38 = vadd.f32 %v2453_v29, %v1337_v31  ;;  %v1283_v31 = vld [vmem:[#allocation2 + $0x348] sm:$0xff] }
 0xa21   : > { %v1342_v37 = vadd.f32 %v2453_v29, %v1336_v33  ;;  %v1282_v29 = vld [vmem:[#allocation2 + $0x340] sm:$0xff] }
 0xa22   : > { %v3393_v33 = vpack.c.bf16 %v1283_v31, %v1282_v29 }
 0xa23   : > { %2920 = vmatprep.mubr.msk.f32.mxu0 %vm320_vm1, %v1342_v37  ;;  %2942 = vmatprep.mubr.msk.f32.mxu1 %vm320_vm1, %v1342_v37 }
 0xa24   : > { %2921 = vmatmul.mubr.msk.f32.vlgmr.msra.gmra.mrb[8].mxu0 %vm320_vm1, %v1343_v38  ;;  %2943 = vmatmul.mubr.msk.f32.vlgmr.msra.gmra.mrb[14].mxu1 %vm320_vm1, %v1343_v38 }
 0xa25   : > { %3300 = vmatpush3.bf16.msra.mxu0 %v3297_v9  ;;  %2931 = vmatprep.mubr.msk.f32.mxu0 %vm320_vm1, %v1342_v37  ;;  %v1276_v9 = vld [vmem:[#allocation2 + $0x310] sm:$0xff]  ;;  %v3397_v37 = vpack.c.bf16 %v1285_v36, %v1284_v35  ;;  %v1293_v36 = vld [vmem:[#allocation2 + $0x398] sm:$0xff] }
 0xa26   : > { %3302 = vmatprep.subr.bf16.mxu0 %v3301_v39  ;;  %3348 = vmatpush3.bf16.msra.mxu1 %v3786_v59  ;;  %v3381_v18 = vpack.c.bf16 %v1277_v11, %v1276_v9  ;;  %v1292_v35 = vld [vmem:[#allocation2 + $0x390] sm:$0xff] }
 0xa27   : > { %3350 = vmatprep.subr.bf16.mxu1 %v3789_v10 }
 0xa29   : > { %3304 = vmatpush3.bf16.msra.mxu0 %v3301_v39  ;;  %v1287_v39 = vld [vmem:[#allocation2 + $0x368] sm:$0xff] }
 0xa2a   : > { %3314 = vmatprep.subr.bf16.mxu0 %v3786_v59  ;;  %3352 = vmatpush3.bf16.msra.mxu1 %v3789_v10 }
 0xa2b   : > { %3354 = vmatprep.subr.bf16.mxu1 %v3796_v14 }
 0xa2c   : > { %2932 = vmatmul.mubr.msk.f32.vlgmr.msra.gmra.mrb[10].mxu0 %vm320_vm1, %v1343_v38  ;;  %v1286_v38 = vld [vmem:[#allocation2 + $0x360] sm:$0xff] }
 0xa2d   : > { %3316 = vmatpush3.bf16.msra.mxu0 %v3786_v59 }
 0xa2e   : > { %3318 = vmatprep.subr.bf16.mxu0 %v3789_v10  ;;  %3356 = vmatpush3.bf16.msra.mxu1 %v3796_v14 }
 0xa2f   : > { %3358 = vmatprep.subr.bf16.mxu1 %v3801_v17 }
 0xa31   : > { %3320 = vmatpush3.bf16.msra.mxu0 %v3789_v10 }
 0xa32   : > { %3322 = vmatprep.subr.bf16.mxu0 %v3796_v14  ;;  %3360 = vmatpush3.bf16.msra.mxu1 %v3801_v17 }
 0xa33   : > { %3362 = vmatprep.subr.bf16.mxu1 %v3808_v20 }
 0xa35   : > { %3324 = vmatpush3.bf16.msra.mxu0 %v3796_v14 }
 0xa36   : > { %3326 = vmatprep.subr.bf16.mxu0 %v3801_v17  ;;  %3364 = vmatpush3.bf16.msra.mxu1 %v3808_v20 }
 0xa37   : > { %3366 = vmatprep.subr.bf16.mxu1 %v3814_v23 }
 0xa39   : > { %3328 = vmatpush3.bf16.msra.mxu0 %v3801_v17 }
 0xa3a   : > { %3330 = vmatprep.subr.bf16.mxu0 %v3808_v20  ;;  %3368 = vmatpush3.bf16.msra.mxu1 %v3814_v23 }
 0xa3b   : > { %3370 = vmatprep.subr.bf16.mxu1 %v3826_v27 }
 0xa3d   : > { %3332 = vmatpush3.bf16.msra.mxu0 %v3808_v20 }
 0xa3e   : > { %3334 = vmatprep.subr.bf16.mxu0 %v3814_v23  ;;  %3372 = vmatpush3.bf16.msra.mxu1 %v3826_v27 }
 0xa3f   : > { %3374 = vmatprep.subr.bf16.mxu1 %v3832_v30 }
 0xa41   : > { %3336 = vmatpush3.bf16.msra.mxu0 %v3814_v23 }
 0xa42   : > { %3338 = vmatprep.subr.bf16.mxu0 %v3826_v27  ;;  %3376 = vmatpush3.bf16.msra.mxu1 %v3832_v30 }
 0xa43   : > { %3020 = vmatprep.subr.msk.mxu1 %vm776_vm3, %v3842_v41 }
 0xa45   : > { %3340 = vmatpush3.bf16.msra.mxu0 %v3826_v27  ;;  %v1274_v27 = vld [vmem:[#allocation2 + $0x300] sm:$0xff] }
 0xa46   : > { %3342 = vmatprep.subr.bf16.mxu0 %v3832_v30 }
 0xa49   : > { %3344 = vmatpush3.bf16.msra.mxu0 %v3832_v30  ;;  %v1275_v30 = vld [vmem:[#allocation2 + $0x308] sm:$0xff] }
 0xa4a   : > { %3015 = vmatprep.subr.msk.mxu0 %vm776_vm3, %v3842_v41  ;;  %v3377_v45 = vpack.c.bf16 %v1275_v30, %v1274_v27 }
 0xaf7   : > { %v2922_v59 = vpop.f32.mrb[8].mxu0  ;;  %v3932_v10 = vpop.f32.mrb[14].mxu1 }
 0xaf8   : > { %v1416_v14 = vpop.f32.mrb[9].mxu0  ;;  %v3934_v17 = vpop.f32.mrb[15].mxu1 }
 0xaff   : > { %v2933_v20 = vpop.f32.mrb[10].mxu0 }
 0xb00   : > { %v1576_v23 = vmul.f32 %v2933_v20, %v2922_v59  ;;  %v1654_v40 = vmul.f32 %v2933_v20, %v1416_v14  ;;  %v1491_v42 = vpop.f32.mrb[11].mxu0  ;;  %v1289_v20 = vld [vmem:[#allocation2 + $0x378] sm:$0xff] }
 0xb01   : > { %v1575_v43 = vmul.f32 %v1491_v42, %v1416_v14  ;;  %v1655_v44 = vmul.f32 %v2922_v59, %v1491_v42  ;;  %v3401_v59 = vpack.c.bf16 %v1287_v39, %v1286_v38  ;;  %v1288_v14 = vld [vmem:[#allocation2 + $0x370] sm:$0xff]  ;;  %v1294_v38 = vld [vmem:[#allocation2 + $0x3a0] sm:$0xff]  ;;  %v1295_v39 = vld [vmem:[#allocation2 + $0x3a8] sm:$0xff] }
 0xb02   : > { %3012 = vmatprep.mubr.f32.mxu1 %v1654_v40 }
 0xb03   : > { %2977 = vmatprep.mubr.f32.mxu0 %v1575_v43  ;;  %3013 = vmatmul.mubr.f32.vlgmr.msra.gmra.mrb[16].mxu1 %v1655_v44 }
 0xb04   : > { %2978 = vmatmul.mubr.f32.vlgmr.msra.gmra.mrb[12].mxu0 %v1576_v23  ;;  %3021 = vmatpush3.msk.msra.mxu1 %vm776_vm3, %v3842_v41  ;;  %v3405_v23 = vpack.c.bf16 %v1289_v20, %v1288_v14  ;;  %v1296_v14 = vld [vmem:[#allocation2 + $0x3b0] sm:$0xff]  ;;  %v1297_v20 = vld [vmem:[#allocation2 + $0x3b8] sm:$0xff] }
 0xb05   : > { %3016 = vmatpush3.msk.msra.mxu0 %vm776_vm3, %v3842_v41 }
 0xb06   : > { %3378 = vmatprep.subr.bf16.mxu0 %v3377_v45 }
 0xbd6   : > { %v3014_v48 = vpop.f32.mrb[16].mxu1 }
 0xbd7   : > { %v1732_v49 = vmul.f32 0.125, %v3014_v48  ;;  %v2979_v50 = vpop.f32.mrb[12].mxu0  ;;  %v1722_v51 = vpop.f32.mrb[17].mxu1 }
 0xbd8   : > { %v1653_v52 = vmul.f32 0.125, %v2979_v50  ;;  %v1731_v53 = vmul.f32 0.125, %v1722_v51  ;;  %v1643_v63 = vpop.f32.mrb[13].mxu0 }
 0xbd9   : > { %v1652_v2 = vmul.f32 0.125, %v1643_v63 }
 0xbda   : > { %v1734_v54 = vmax.f32 %v1653_v52, %v1732_v49 }
 0xbdb   : > { %v1733_v55 = vmax.f32 %v1652_v2, %v1731_v53 }
 0xbdc   : > { %v1736_v56 = vsub.f32 %v1653_v52, %v1734_v54  ;;  %v1742_v57 = vsub.f32 %v1732_v49, %v1734_v54  ;;  %v2466_v52 = vld [vmem:[#allocation2 + $0x27a] ss:$0 sm:$0xff] }
 0xbdd   : > { %v1735_v58 = vsub.f32 %v1652_v2, %v1733_v55  ;;  %v1741_v60 = vsub.f32 %v1731_v53, %v1733_v55 }
 0xbde   : > { %v1739_v61 = vmul.f32 1.442695, %v1736_v56  ;;  %v1745_v41 = vmul.f32 1.442695, %v1742_v57 }
 0xbdf   : > { %v1737_v62 = vmul.f32 1.442695, %v1735_v58  ;;  %v1743_v34 = vmul.f32 1.442695, %v1741_v60 }
 0xbe0   : > { %3538 = vpow2.f32 %v1739_v61 }
 0xbe1   : > { %3540 = vpow2.f32 %v1745_v41 }
 0xbe2   : > { %3542 = vpow2.f32 %v1737_v62 }
 0xbe3   : > { %3544 = vpow2.f32 %v1743_v34  ;;  %v1270_v34 = vld [vmem:[#allocation2 + $0x2e0] sm:$0xff] }
 0xbea   : > { %v3539_v32 = vpop.eup %3538 }
 0xbeb   : > { %v3541_v3 = vpop.eup %3540 }
 0xbec   : > { %v3543_v4 = vpop.eup %3542  ;;  %v1748_v5 = vadd.f32 %v3541_v3, %v3539_v32 }
 0xbed   : > { %v3545_v6 = vpop.eup %3544 }
 0xbee   : > { %3546 = vrcp.f32 %v1748_v5  ;;  %v1747_v25 = vadd.f32 %v3545_v6, %v3543_v4  ;;  %v1273_v5 = vld [vmem:[#allocation2 + $0x2f8] sm:$0xff] }
 0xbf0   : > { %3548 = vrcp.f32 %v1747_v25  ;;  %v1290_v25 = vld [vmem:[#allocation2 + $0x380] sm:$0xff] }
 0xbf8   : > { %v3547_v12 = vpop.eup %3546 }
 0xbf9   : > { %v1752_v7 = vmul.f32 %v3547_v12, %v3539_v32  ;;  %v1835_v8 = vmul.f32 %v3547_v12, %v3541_v3  ;;  %v1271_v32 = vld [vmem:[#allocation2 + $0x2e8] sm:$0xff] }
 0xbfa   : > { %v3549_v13 = vpop.eup %3548  ;;  %v3409_v3 = vpack.c.bf16 %v1271_v32, %v1270_v34  ;;  %v1291_v12 = vld [vmem:[#allocation2 + $0x388] sm:$0xff] }
 0xbfb   : > { %v1751_v15 = vmul.f32 %v3549_v13, %v3543_v4  ;;  %v1834_v16 = vmul.f32 %v3549_v13, %v3545_v6  ;;  %v1272_v4 = vld [vmem:[#allocation2 + $0x2f0] sm:$0xff] }
 0xbfc   : > { %3410 = vmatprep.subr.bf16.mxu1 %v3409_v3  ;;  %v3413_v6 = vpack.c.bf16 %v1273_v5, %v1272_v4 }
 0xbfd   : > { %3017 = vmatprep.mubr.msk.f32.mxu0 %vm769_vm4, %v1751_v15  ;;  %3022 = vmatprep.mubr.msk.f32.mxu1 %vm769_vm4, %v1834_v16 }
 0xbfe   : > { %3018 = vmatmul.mubr.msk.f32.vlgmr.msra.gmra.mrb[14].mxu0 %vm769_vm4, %v1752_v7  ;;  %3023 = vmatmul.mubr.msk.f32.vlgmr.msra.gmra.mrb[18].mxu1 %vm769_vm4, %v1835_v8  ;;  %v3417_v7 = vpack.c.bf16 %v1291_v12, %v1290_v25 }
 0xbff   : > { %3380 = vmatpush3.bf16.msra.mxu0 %v3377_v45  ;;  %3412 = vmatpush3.bf16.msra.mxu1 %v3409_v3 }
 0xc00   : > { %3382 = vmatprep.subr.bf16.mxu0 %v3381_v18  ;;  %3414 = vmatprep.subr.bf16.mxu1 %v3413_v6 }
 0xc03   : > { %3384 = vmatpush3.bf16.msra.mxu0 %v3381_v18  ;;  %3416 = vmatpush3.bf16.msra.mxu1 %v3413_v6 }
 0xc04   : > { %3386 = vmatprep.subr.bf16.mxu0 %v3385_v22  ;;  %3418 = vmatprep.subr.bf16.mxu1 %v3417_v7 }
 0xc07   : > { %3388 = vmatpush3.bf16.msra.mxu0 %v3385_v22 }
 0xc08   : > { %3390 = vmatprep.subr.bf16.mxu0 %v3389_v28 }
 0xc0b   : > { %3392 = vmatpush3.bf16.msra.mxu0 %v3389_v28 }
 0xc0c   : > { %3394 = vmatprep.subr.bf16.mxu0 %v3393_v33 }
 0xc0f   : > { %3396 = vmatpush3.bf16.msra.mxu0 %v3393_v33 }
 0xc10   : > { %3398 = vmatprep.subr.bf16.mxu0 %v3397_v37 }
 0xc13   : > { %3400 = vmatpush3.bf16.msra.mxu0 %v3397_v37  ;;  %v3421_v37 = vpack.c.bf16 %v1293_v36, %v1292_v35 }
 0xc14   : > { %3402 = vmatprep.subr.bf16.mxu0 %v3401_v59 }
 0xc17   : > { %3404 = vmatpush3.bf16.msra.mxu0 %v3401_v59  ;;  %v3425_v59 = vpack.c.bf16 %v1295_v39, %v1294_v38  ;;  %v2474_v39 = vld [vmem:[#allocation2 + $0x3] ss:$0 sm:$0xff] }
 0xc18   : > { %3406 = vmatprep.subr.bf16.mxu0 %v3405_v23 }
 0xc1b   : > { %3408 = vmatpush3.bf16.msra.mxu0 %v3405_v23  ;;  %v3429_v23 = vpack.c.bf16 %v1297_v20, %v1296_v14 }
 0xc1c   : > { %3449 = vmatprep.subr.bf16.mxu0 %v3659_v0 }
 0xcd1   : > { %v3019_v40 = vpop.f32.mrb[14].mxu0  ;;  %v3024_v42 = vpop.f32.mrb[18].mxu1 }
 0xcd2   : > { %v1918_v43 = vmul.f32 %v3019_v40, %v3932_v10  ;;  %v1920_v44 = vmul.f32 %v3024_v42, %v3934_v17  ;;  %v1825_v27 = vpop.f32.mrb[15].mxu0  ;;  %v1908_v30 = vpop.f32.mrb[19].mxu1  ;;  %v1298_v40 = vld [vmem:[#allocation2 + $0x3c0] sm:$0xff]  ;;  %v1299_v42 = vld [vmem:[#allocation2 + $0x3c8] sm:$0xff] }
 0xcd3   : > { %v1917_v45 = vmul.f32 %v1825_v27, %v3934_v17  ;;  %v1919_v48 = vmul.f32 %v3932_v10, %v1908_v30  ;;  %v1301_v27 = vld [vmem:[#allocation2 + $0x3d8] sm:$0xff] }
 0xcd4   : > { %v1922_v49 = vadd.f32 %v1920_v44, %v1918_v43  ;;  %v1300_v43 = vld [vmem:[#allocation2 + $0x3d0] sm:$0xff]  ;;  %v3433_v44 = vpack.c.bf16 %v1299_v42, %v1298_v40 }
 0xcd5   : > { %v1921_v50 = vadd.f32 %v1919_v48, %v1917_v45  ;;  %v3437_v30 = vpack.c.bf16 %v1301_v27, %v1300_v43  ;;  %v1302_v45 = vld [vmem:[#allocation2 + $0x3e0] sm:$0xff]  ;;  %v1303_v48 = vld [vmem:[#allocation2 + $0x3e8] sm:$0xff] }
 0xcd7   : > { %3057 = vmatprep.mubr.f32.mxu0 %v1921_v50  ;;  %v1304_v50 = vld [vmem:[#allocation2 + $0x3f0] sm:$0xff] }
 0xcd8   : > { %3058 = vmatmul.mubr.f32.vlgmr.msra.gmra.mrb[16].mxu0 %v1922_v49  ;;  %v3441_v49 = vpack.c.bf16 %v1303_v48, %v1302_v45 }
 0xcd9   : > { %3114 = vmatprep.mubr.msk.f32.mxu0 %vm3660_vm0, %v3661_v1 }
 0xdab   : > { %v3059_v51 = vpop.f32.mrb[16].mxu0 }
 0xdac   : > { %v1999_v53 = vadd.f32 %v3059_v51, %v3878_v46  ;;  %v1989_v63 = vpop.f32.mrb[17].mxu0  ;;  %v1305_v51 = vld [vmem:[#allocation2 + $0x3f8] sm:$0xff] }
 0xdad   : > { %v1998_v2 = vadd.f32 %v1989_v63, %v3880_v47 }
 0xdae   : > { %v2005_v54 = vadd.f32 %v2466_v52, %v1999_v53  ;;  %v2469_v53 = vld [vmem:[#allocation2 + $0x27e] ss:$0 sm:$0xff] }
 0xdaf   : > { %v3953_v55 = vadd.f32 %v2466_v52, %v1998_v2  ;;  %v3445_v52 = vpack.c.bf16 %v1305_v51, %v1304_v50 }
 0xdb0   : > { %v2009_v17 = vsel %vm320_vm1, %v2005_v54, 0.0 }
 0xdb1   : > { %2010 = vadd.xlane.f32.xlu1 %v2009_v17  ;;  %v2006_v10 = vsel %vm320_vm1, %v3953_v55, 0.0 }
 0xdb2   : > { %2007 = vadd.xlane.f32.xlu0 %v2006_v10 }
 0xe3e   : > { %v2011_v56 = vpop.xlane.xlu1 %2010 }
 0xe3f   : > { %v2013_v57 = vmul.f32 0.03125, %v2011_v56  ;;  %v2008_v1 = vpop.xlane.xlu0 %2007 }
 0xe40   : > { %v2012_v58 = vmul.f32 0.03125, %v2008_v1 }
 0xe41   : > { %v2015_v60 = vsub.f32 %v2005_v54, %v2013_v57 }
 0xe42   : > { %v2014_v46 = vsub.f32 %v3953_v55, %v2012_v58 }
 0xe43   : > { %v2017_v61 = vmul.f32 %v2015_v60, %v2015_v60 }
 0xe44   : > { %v2016_v41 = vmul.f32 %v2014_v46, %v2014_v46 }
 0xe45   : > { %v2021_v47 = vsel %vm320_vm1, %v2017_v61, 0.0 }
 0xe46   : > { %2022 = vadd.xlane.f32.xlu1 %v2021_v47  ;;  %v2018_v62 = vsel %vm320_vm1, %v2016_v41, 0.0 }
 0xe47   : > { %2019 = vadd.xlane.f32.xlu0 %v2018_v62 }
 0xed3   : > { %v2023_v8 = vpop.xlane.xlu1 %2022 }
 0xed4   : > { %v2025_v9 = vmul.f32 0.03125, %v2023_v8  ;;  %v2020_v11 = vpop.xlane.xlu0 %2019  ;;  %v2472_v8 = vld [vmem:[#allocation2 + $0x27d] ss:$0 sm:$0xff] }
 0xed5   : > { %v2024_v13 = vmul.f32 0.03125, %v2020_v11 }
 0xed6   : > { %v2027_v15 = vadd.f32 1e-05, %v2025_v9 }
 0xed7   : > { %v2026_v16 = vadd.f32 1e-05, %v2024_v13 }
 0xed8   : > { %3550 = vrsqrt.f32 %v2027_v15 }
 0xed9   : > { %3552 = vrsqrt.f32 %v2026_v16 }
 0xee2   : > { %v3551_v18 = vpop.eup %3550 }
 0xee3   : > { %v3553_v21 = vpop.eup %3552  ;;  %v2031_v22 = vmul.f32 %v3551_v18, %v2015_v60 }
 0xee4   : > { %v2030_v24 = vmul.f32 %v3553_v21, %v2014_v46 }
 0xee5   : > { %v2037_v28 = vmul.f32 %v2467_v19, %v2031_v22  ;;  %v2252_v22 = vld [vmem:[#allocation2 + $0x48] sm:$0xff] }
 0xee6   : > { %v2036_v29 = vmul.f32 %v2467_v19, %v2030_v24  ;;  %v2253_v24 = vld [vmem:[#allocation2 + $0x50] sm:$0xff] }
 0xee7   : > { %v2043_v33 = vadd.f32 %v2468_v26, %v2037_v28  ;;  %v2254_v28 = vld [vmem:[#allocation2 + $0x58] sm:$0xff] }
 0xee8   : > { %v2042_v31 = vadd.f32 %v2468_v26, %v2036_v29  ;;  %v3450_v26 = vpack.c.bf16 %v2253_v24, %v2252_v22 }
 0xeea   : > { %3068 = vmatprep.mubr.msk.f32.mxu1 %vm320_vm1, %v2042_v31  ;;  %3451 = vmatpush3.bf16.msra.mxu0 %v3450_v26 }
 0xeeb   : > { %3069 = vmatmul.mubr.msk.f32.vlgmr.msra.gmra.mrb[20].mxu1 %vm320_vm1, %v2043_v33  ;;  %3452 = vmatprep.subr.bf16.mxu0 %v3659_v0  ;;  %v2475_v0 = vld [vmem:[#allocation2 + $0x4] ss:$0 sm:$0xff] }
 0xeec   : > { %3420 = vmatpush3.bf16.msra.mxu1 %v3417_v7 }
 0xeed   : > { %3422 = vmatprep.subr.bf16.mxu1 %v3421_v37 }
 0xef0   : > { %3424 = vmatpush3.bf16.msra.mxu1 %v3421_v37  ;;  %v2473_v37 = vld [vmem:[#allocation2 + $0x2] ss:$0 sm:$0xff] }
 0xef1   : > { %3426 = vmatprep.subr.bf16.mxu1 %v3425_v59 }
 0xef4   : > { %3428 = vmatpush3.bf16.msra.mxu1 %v3425_v59 }
 0xef5   : > { %3430 = vmatprep.subr.bf16.mxu1 %v3429_v23 }
 0xef8   : > { %3432 = vmatpush3.bf16.msra.mxu1 %v3429_v23 }
 0xef9   : > { %3434 = vmatprep.subr.bf16.mxu1 %v3433_v44 }
 0xefc   : > { %3436 = vmatpush3.bf16.msra.mxu1 %v3433_v44 }
 0xefd   : > { %3438 = vmatprep.subr.bf16.mxu1 %v3437_v30 }
 0xf00   : > { %3440 = vmatpush3.bf16.msra.mxu1 %v3437_v30 }
 0xf01   : > { %3442 = vmatprep.subr.bf16.mxu1 %v3441_v49 }
 0xf04   : > { %3444 = vmatpush3.bf16.msra.mxu1 %v3441_v49 }
 0xf05   : > { %3446 = vmatprep.subr.bf16.mxu1 %v3445_v52 }
 0xf08   : > { %3448 = vmatpush3.bf16.msra.mxu1 %v3445_v52 }
 0xfbe   : > { %v3070_v63 = vpop.f32.mrb[20].mxu1 }
 0xfbf   : > { %v2126_v2 = vadd.f32 %v3070_v63, %v2469_v53  ;;  %v2120_v54 = vpop.f32.mrb[21].mxu1 }
 0xfc0   : > { %v2121_v17 = vadd.f32 %v2469_v53, %v2120_v54 }
 0xfc1   : > { %v2132_v10 = vmul.f32 0.044715, %v2126_v2  ;;  %v2130_v5 = vmul.f32 0.5, %v2126_v2 }
 0xfc2   : > { %v2131_v56 = vmul.f32 0.044715, %v2121_v17  ;;  %v2129_v3 = vmul.f32 0.5, %v2121_v17 }
 0xfc3   : > { %v2134_v57 = vmul.f32 %v2132_v10, %v2126_v2 }
 0xfc4   : > { %v2133_v1 = vmul.f32 %v2131_v56, %v2121_v17 }
 0xfc5   : > { %v2136_v58 = vmul.f32 %v2134_v57, %v2126_v2 }
 0xfc6   : > { %v2135_v60 = vmul.f32 %v2133_v1, %v2121_v17 }
 0xfc7   : > { %v2138_v46 = vadd.f32 %v2136_v58, %v2126_v2 }
 0xfc8   : > { %v2137_v61 = vadd.f32 %v2135_v60, %v2121_v17 }
 0xfc9   : > { %v2140_v41 = vmul.f32 0.7978846, %v2138_v46 }
 0xfca   : > { %v2139_v47 = vmul.f32 0.7978846, %v2137_v61 }
 0xfcb   : > { %3554 = vtanh.f32 %v2140_v41 }
 0xfcc   : > { %3556 = vtanh.f32 %v2139_v47 }
 0xfd5   : > { %v3555_v62 = vpop.eup %3554 }
 0xfd6   : > { %v3557_v34 = vpop.eup %3556  ;;  %v2144_v32 = vadd.f32 1.0, %v3555_v62 }
 0xfd7   : > { %v2143_v4 = vadd.f32 1.0, %v3557_v34 }
 0xfd8   : > { %v2146_v25 = vmul.f32 %v2144_v32, %v2130_v5 }
 0xfd9   : > { %v2145_v6 = vmul.f32 %v2143_v4, %v2129_v3 }
 0xfdb   : > { %3103 = vmatprep.mubr.f32.mxu1 %v2145_v6 }
 0xfdc   : > { %3104 = vmatmul.mubr.f32.vlgmr.msra.gmra.mrb[22].mxu1 %v2146_v25 }
0x10af   : > { %v3105_v12 = vpop.f32.mrb[22].mxu1 }
0x10b0   : > { %v2213_v7 = vpop.f32.mrb[23].mxu1 }
0x10b1   : > { %v2221_v9 = vadd.f32 %v2213_v7, %v3953_v55  ;;  %v2255_v55 = vld [vmem:[#allocation2 + $0x60] sm:$0xff] }
0x10b2   : > { %v3453_v29 = vpack.c.bf16 %v2255_v55, %v2254_v28 }
0x10b3   : > { %v2226_v11 = vadd.f32 %v2472_v8, %v2221_v9 }
0x10b4   : > { %3454 = vmatpush3.bf16.msra.mxu0 %v3453_v29 }
0x10b5   : > { %v2229_v13 = vsel %vm320_vm1, %v2226_v11, 0.0 }
0x10b6   : > { %2230 = vadd.xlane.f32.xlu0 %v2229_v13 }
0x1143   : > { %v2231_v15 = vpop.xlane.xlu0 %2230 }
0x1144   : > { %v2232_v16 = vmul.f32 0.03125, %v2231_v15 }
0x1146   : > { %v2233_v18 = vsub.f32 %v2226_v11, %v2232_v16 }
0x1148   : > { %v2234_v19 = vmul.f32 %v2233_v18, %v2233_v18 }
0x114a   : > { %v2235_v21 = vsel %vm320_vm1, %v2234_v19, 0.0 }
0x114b   : > { %2236 = vadd.xlane.f32.xlu1 %v2235_v21 }
0x11d8   : > { %v2237_v31 = vpop.xlane.xlu1 %2236 }
0x11d9   : > { %v2238_v33 = vmul.f32 0.03125, %v2237_v31 }
0x11db   : > { %v2239_v35 = vadd.f32 1e-05, %v2238_v33 }
0x11dd   : > { %3558 = vrsqrt.f32 %v2239_v35 }
0x11e7   : > { %v3559_v36 = vpop.eup %3558 }
0x11e8   : > { %v2241_v38 = vmul.f32 %v3559_v36, %v2233_v18 }
0x11ea   : > { %v2246_v59 = vmul.f32 %v2473_v37, %v2241_v38 }
0x11ec   : > { %v2251_v14 = vadd.f32 %v2474_v39, %v2246_v59 }
0x11ee   : > { %3115 = vmatmul.mubr.msk.f32.vlgmr.msra.gmra.mrb[18].mxu0 %vm320_vm1, %v2251_v14 }
0x12c1   : > { %v2330_v20 = vpop.f32.mrb[18].mxu0 }
0x12c2   : > { %v2331_v23 = vadd.f32 %v2475_v0, %v2330_v20  ;;  %v3116_v40 = vpop.f32.mrb[19].mxu0 }
0x12c4   : > { %2334 = vst.msk [vmem:[%s149_s26] sm:$0xff] %vm320_vm1, %v2331_v23 }
0x12c5   : > { %3601 = shalt.err (!%p3598_p7)
}
0x12c6   : > { %s3602_s7 = scalar_lea.hbm %s3973_s30, 128  ;;  %s3606_s16 = scalar_lea.hbm %s4018_s2, 256 }
0x12c7   : > { %p3603_p8 = scmp.ne.s32.totalorder %s3973_s30, %s3602_s7  ;;  %p3607_p1 = scmp.lt.u32.totalorder %s3973_s30, %s4018_s2 }
0x12c8   : > { %p3608_p0 = scmp.lt.u32.totalorder %s3606_s16, %s3602_s7  ;;  %p3610_p6 = scmp.lt.u32.totalorder %s3602_s7, %s3973_s30 }
0x12c9   : > { %p3604_p11 = pnand %p3603_p8, %p4029_p9 }
0x12ca   : > { %p3609_p5 = por %p3608_p0, %p3607_p1 }
0x12cb   : > { %p3605_p13 = pneg %p3604_p11 }
0x12cc   : > { %p3611_p10 = por %p3610_p6, %p3609_p5 }
0x12ce   : > { %p3612_p12 = pnand %p3611_p10, %p3605_p13 }
0x12d0   : > { %3615 = shalt.err (!%p3612_p12)
}
0x12d1   : > { %3459 = dma.vmem_to_hbm [thread:$0]  (%p4029_p9), %s3975_s27, 128, %s3973_s30, %s2336_s3  }
0x12d2 PF: > { %p3471_p2 = scmp.ge.s32.totalorder %s3654_s12, 2  ;;  %s2361_s22 = sand.u32 1, %s3642_s9  }
0x12d3   : > { %p4030_p3 = scmp.ne.s32.totalorder %s4023_s20, 0  ;;  %s2362_s23 = scalar_lea.sflag [#allocation4], %s2361_s22 }
0x12d5   : > { %p3466_p4 = pnand %p3471_p2, %p4030_p3 }
0x12d7   : > { %3637 = dma.done.wait (!%p3466_p4), %s2362_s23, 128  }
0x12d8   : > { %3639 = vsyncadd (!%p3466_p4), %s2362_s23, 4294967168  ;;  %p13_p7 = scmp.ge.s32.totalorder %s3703_s15, 4   ;;  %s4031_s9 = smov %s3646_s10 }
0x12d9   : > { %s4032_s10 = smov %s3650_s11  ;;  %s4033_s11 = smov %s3714_s18 }
0x12da   : > { %s4034_s12 = smov %s3703_s15  ;;  %15 = sbr.rel (!%p13_p7) target bundleno = 4 (0x4), region = 68 }
0x12e1   :  { %2367 = vsyncpa [#allocation3], 1 }
0x12e2   :  { %2369 = vsyncpa [#allocation3 + $0x1], 1 }
0x12e3   :  { %2370 = vsyncpa [#allocation4], 1 }
0x12e4   :  { %2372 = vsyncpa [#allocation4 + $0x1], 1 }

</bundles_post_ra>
